<compile_context>
chip_gen: v6e
topology: v6e:2x2x1
jax: 0.10.0
libtpu: 0.0.40
codegen_flags: <defaults>
</compile_context>

<pallas_src>
import functools
import math

import jax
import jax.numpy as jnp
from jax import lax
from jax.experimental import pallas as pl
from jax.experimental.pallas import tpu as pltpu


# ---------------------------------------------------------------------------
# Kernel
# ---------------------------------------------------------------------------

def _compression_kernel(x_ref, w_ref, gamma_ref, beta_ref, o_ref, acc_ref,
                        *, B, H, W, D, C, Cp):
    """Processes B samples per grid step.

    x_ref    : (B, H*W, D)   backbone tokens (row-major h*W + w), f32 or bf16
    w_ref    : (D, 9*Cp)     3x3 conv weight, taps stacked along lanes (C zero-padded)
    gamma_ref: (1, Cp)       GroupNorm scale (zero in padded channels)
    beta_ref : (1, Cp)       GroupNorm shift (zero in padded channels)
    o_ref    : (B, H, W, Cp) lane-dense NHWC output (padded channels are exactly 0)
    acc_ref  : (B, H, W, Cp) f32 VMEM scratch -- conv accumulator (no halo)
    """
    # One wide MXU matmul for all 9 taps: (B*H*W, D) @ (D, 9*Cp), f32 accumulation.
    xf = x_ref[...].reshape(B * H * W, D)
    taps = jnp.dot(xf, w_ref[...], preferred_element_type=jnp.float32)

    # Edge masks for the in-register width shift (hoisted: built once per grid step).
    w_pos = lax.broadcasted_iota(jnp.int32, (1, 1, W, Cp), 2)
    mask_l = (w_pos > 0).astype(jnp.float32)        # zero the wrapped column (w == 0)
    mask_r = (w_pos < W - 1).astype(jnp.float32)    # zero the wrapped column (w == W-1)

    def tap(k):
        ky, kx = divmod(k, 3)
        t = taps[:, k * Cp:(k + 1) * Cp].reshape(B, H, W, Cp)  # free 128-aligned slice
        if kx == 0:      # t'[w] = t[w-1], zero at w == 0   (XLU sublane rotate + mask)
            t = pltpu.roll(t, shift=1, axis=2) * mask_l
        elif kx == 2:    # t'[w] = t[w+1], zero at w == W-1
            t = pltpu.roll(t, shift=W - 1, axis=2) * mask_r
        return t, ky - 1                                        # dy in {-1, 0, +1}

    # Center tap covers every output cell -> plain assignment, no zero-init pass.
    t_c, _ = tap(4)
    acc_ref[...] = t_c
    for k in (0, 1, 2, 3, 5, 6, 7, 8):
        t, dy = tap(k)
        if dy == 0:
            acc_ref[...] += t
        elif dy == -1:   # out[h] += t'[h-1] (valid h >= 1); H slices are tile-aligned
            acc_ref[:, 1:H, :, :] += t[:, 0:H - 1, :, :]
        else:            # dy == +1: out[h] += t'[h+1] (valid h <= H-2)
            acc_ref[:, 0:H - 1, :, :] += t[:, 1:H, :, :]

    conv = acc_ref[...]                               # (B, H, W, Cp) f32, aligned read

    # GroupNorm(num_groups=1): per-sample stats over (C, H, W).  Padded channels hold
    # exact zeros (zero weight columns), so reducing over Cp is exact; only the divisor
    # uses the real element count.  Single pass: sum + sum-of-squares over one loaded
    # value, then one normalize+ReLU+store pass.
    cnt = jnp.float32(H * W * C)
    s1 = jnp.sum(conv, axis=(1, 2, 3), keepdims=True)
    s2 = jnp.sum(conv * conv, axis=(1, 2, 3), keepdims=True)
    mean = s1 / cnt
    var = jnp.maximum(s2 / cnt - mean * mean, 0.0)    # biased variance (PyTorch GN)
    inv = lax.rsqrt(var + 1e-5)

    scale = gamma_ref[...].reshape(1, 1, 1, Cp) * inv            # (B, 1, 1, Cp)
    shift = beta_ref[...].reshape(1, 1, 1, Cp) - mean * scale    # 0 in padded channels
    o_ref[...] = jnp.maximum(conv * scale + shift, 0.0).astype(o_ref.dtype)


# ---------------------------------------------------------------------------
# Parameter packing (done once, outside the per-forward path)
# ---------------------------------------------------------------------------

def _lane_pad(c):
    return ((c + 127) // 128) * 128


def pack_conv_weight(w_hwio, Cp):
    """(3, 3, D, C) HWIO conv weight -> (D, 9*Cp) with zero-padded output channels."""
    kh, kw, D, C = w_hwio.shape
    w_p = jnp.zeros((kh, kw, D, Cp), w_hwio.dtype).at[..., :C].set(w_hwio)
    return jnp.transpose(w_p, (2, 0, 1, 3)).reshape(D, kh * kw * Cp)


def pack_affine(v, Cp):
    C = v.shape[0]
    return jnp.zeros((1, Cp), jnp.float32).at[0, :C].set(v.astype(jnp.float32))


# ---------------------------------------------------------------------------
# Generation-aware block sizing
# ---------------------------------------------------------------------------

def _vmem_capacity_bytes():
    try:
        return int(pltpu.get_tpu_info().vmem_capacity_bytes)
    except Exception:
        return 64 * 1024 * 1024     # conservative default (v7x per-core VMEM)


def _step_vmem_bytes(bb, L, D, H, W, Cp, tok_bytes, w_bytes, out_bytes):
    tokens  = 2 * bb * L * D * tok_bytes                   # double-buffered token blocks
    weights = 2 * (9 * D * Cp * w_bytes + 2 * Cp * 4)      # conservative: double-buffered
    out     = 2 * bb * H * W * Cp * out_bytes              # double-buffered output blocks
    acc     = bb * H * W * Cp * 4                          # conv accumulator (scratch)
    taps    = bb * L * 9 * Cp * 4                          # fused-matmul result temporary
    vals    = bb * H * W * Cp * 4                          # slack for value temporaries
    return tokens + weights + out + acc + taps + vals


def _pick_block_batch(n, max_bb, fits, min_steps=4):
    divisors = [d for d in range(1, max(1, min(n, max_bb)) + 1) if n % d == 0]
    fitting = [d for d in divisors if fits(d)] or divisors[:1]
    for steps in (min_steps, 2, 1):
        ok = [d for d in fitting if n // d >= steps]
        if ok:
            return max(ok)
    return fitting[0]


# ---------------------------------------------------------------------------
# pallas_call wrapper
# ---------------------------------------------------------------------------

_CONST_SINGLE_BUFFER = None     # resolved lazily: does BlockSpec accept pl.Buffered(1)?


def compress_tokens(tokens, w_cat, gamma_p, beta_p, *, num_channels,
                    max_block_batch=8, return_layout="nchw", out_dtype=jnp.float32):
    """Conv3x3(pad=1, no bias) + GroupNorm(1, C) + ReLU over (N, L, D) backbone tokens.

    w_cat/gamma_p/beta_p must be pre-packed with pack_conv_weight / pack_affine.
    Returns (N, C, H, W) (PyTorch layout) or, with return_layout="nhwc_padded", the
    kernel's lane-dense (N, H, W, Cp) output (padded channels are exactly zero) --
    preferred when the caller only flattens the features afterwards.
    """
    global _CONST_SINGLE_BUFFER

    N, L, D = tokens.shape
    H = W = math.isqrt(L)
    assert H * W == L, "token count must be a perfect square (use_cls=False)"
    C = num_channels
    Cp = gamma_p.shape[-1]
    assert Cp % 128 == 0 and w_cat.shape == (D, 9 * Cp)

    tok_b = jnp.dtype(tokens.dtype).itemsize
    w_b = jnp.dtype(w_cat.dtype).itemsize
    out_b = jnp.dtype(out_dtype).itemsize

    cap = _vmem_capacity_bytes()
    budget = cap // 2                                   # headroom for compiler temps
    fits = lambda d: _step_vmem_bytes(d, L, D, H, W, Cp, tok_b, w_b, out_b) <= budget
    bb = _pick_block_batch(N, max_block_batch, fits, min_steps=4)
    footprint = _step_vmem_bytes(bb, L, D, H, W, Cp, tok_b, w_b, out_b)
    vmem_limit = int(min(cap * 3 // 4, max(32 * 1024 * 1024, 2 * footprint)))

    kernel = functools.partial(_compression_kernel, B=bb, H=H, W=W, D=D, C=C, Cp=Cp)

    def run(single_buffer_consts):
        kw = {"pipeline_mode": pl.Buffered(1)} if single_buffer_consts else {}
        in_specs = [
            pl.BlockSpec((bb, L, D), lambda n: (n, 0, 0)),
            pl.BlockSpec((D, 9 * Cp), lambda n: (0, 0), **kw),   # constant -> resident
            pl.BlockSpec((1, Cp), lambda n: (0, 0), **kw),
            pl.BlockSpec((1, Cp), lambda n: (0, 0), **kw),
        ]
        return pl.pallas_call(
            kernel,
            out_shape=jax.ShapeDtypeStruct((N, H, W, Cp), out_dtype),
            grid_spec=pltpu.PrefetchScalarGridSpec(
                num_scalar_prefetch=0,
                grid=(N // bb,),
                in_specs=in_specs,
                out_specs=pl.BlockSpec((bb, H, W, Cp), lambda n: (n, 0, 0, 0)),
                scratch_shapes=[pltpu.VMEM((bb, H, W, Cp), jnp.float32)],
            ),
            compiler_params=pltpu.CompilerParams(
                dimension_semantics=("parallel",),
                vmem_limit_bytes=vmem_limit),
        )(tokens, w_cat, gamma_p, beta_p)

    if _CONST_SINGLE_BUFFER is None:
        if hasattr(pl, "Buffered"):
            try:
                out_nhwc = run(True)
                _CONST_SINGLE_BUFFER = True
            except Exception:
                _CONST_SINGLE_BUFFER = False
                out_nhwc = run(False)
        else:
            _CONST_SINGLE_BUFFER = False
            out_nhwc = run(False)
    else:
        out_nhwc = run(_CONST_SINGLE_BUFFER)

    if return_layout == "nhwc_padded":
        return out_nhwc
    # Match PyTorch (N, C, H, W).  For flatten-only consumers prefer
    # return_layout="nhwc_padded" and skip this small relayout + the Cp-padded writeback.
    return jnp.transpose(out_nhwc[..., :C], (0, 3, 1, 2))


# ---------------------------------------------------------------------------
# Module mirror
# ---------------------------------------------------------------------------

class VisualEncoderPallas:
    """Mirror of VisualEncoder (ViT branch, global_pool=False, use_cls=False):
    compression = ViTReshape -> Conv2d(D,C,3,pad=1,no bias) -> GroupNorm(1,C) -> ReLU."""

    def __init__(self, num_patches, embed_dim, key, compute_dtype=jnp.bfloat16):
        final_spatial = math.isqrt(num_patches)
        assert final_spatial * final_spatial == num_patches
        after_compression_flat_size = 2048
        num_compression_channels = int(round(after_compression_flat_size / final_spatial ** 2))
        self.output_shape = (num_compression_channels, final_spatial, final_spatial)
        self.output_size = num_compression_channels * final_spatial * final_spatial
        self.C = num_compression_channels
        self.Cp = _lane_pad(num_compression_channels)
        self.compute_dtype = compute_dtype

        # Conv2d(embed_dim, C, 3, padding=1, bias=False): PyTorch OIHW weight init.
        w_oihw = jax.random.normal(
            key, (num_compression_channels, embed_dim, 3, 3), dtype=jnp.float32) * 0.02
        self.w_hwio = jnp.transpose(w_oihw, (2, 3, 1, 0))        # HWIO master copy (f32)
        # GroupNorm(1, C) default affine init.
        self.gamma = jnp.ones((num_compression_channels,), jnp.float32)
        self.beta = jnp.zeros((num_compression_channels,), jnp.float32)

        # Packed / padded parameters, built ONCE (hoisted out of the per-forward path).
        w_cat = pack_conv_weight(self.w_hwio, self.Cp)
        if compute_dtype is not None:
            w_cat = w_cat.astype(compute_dtype)
        self._w_cat = w_cat
        self._gamma_p = pack_affine(self.gamma, self.Cp)
        self._beta_p = pack_affine(self.beta, self.Cp)

    def forward(self, backbone_tokens, return_layout="nchw"):
        # TODO(synk): visual_transform, avg_pool2d (avgpooled_image), RunningMeanAndVar and
        # the ViT/ResNet backbone are external modules whose source is not provided; this
        # forward implements the compression head starting from the backbone token output.
        x = backbone_tokens
        if self.compute_dtype is not None and x.dtype != self.compute_dtype:
            x = x.astype(self.compute_dtype)
        return compress_tokens(x, self._w_cat, self._gamma_p, self._beta_p,
                               num_channels=self.C, return_layout=return_layout)


# ---------------------------------------------------------------------------
# Pure-JAX reference (ground truth for the compression head)
# ---------------------------------------------------------------------------

def _reference(tokens, w_hwio, gamma, beta):
    N, L, D = tokens.shape
    H = W = math.isqrt(L)
    C = w_hwio.shape[-1]
    x = tokens.reshape(N, H, W, D)
    conv = lax.conv_general_dilated(
        x, w_hwio, window_strides=(1, 1), padding="SAME",
        dimension_numbers=("NHWC", "HWIO", "NHWC"))
    m = conv.mean(axis=(1, 2, 3), keepdims=True)
    v = ((conv - m) ** 2).mean(axis=(1, 2, 3), keepdims=True)
    y = (conv - m) / jnp.sqrt(v + 1e-5)
    y = y * gamma.reshape(1, 1, 1, C) + beta.reshape(1, 1, 1, C)
    y = jnp.maximum(y, 0.0)
    return jnp.transpose(y, (0, 3, 1, 2))


if __name__ == "__main__":
    key = jax.random.PRNGKey(0)
    k_tok, k_w = jax.random.split(key)

    # small ViT-like setting: N=2 envs, L=64 patches (8x8), embed_dim=32 -> C=32
    N, L, D = 2, 64, 32
    tokens = jax.random.normal(k_tok, (N, L, D), dtype=jnp.float32)

    # f32 compute path: strict check against the pure-JAX reference.
    enc_f32 = VisualEncoderPallas(num_patches=L, embed_dim=D, key=k_w, compute_dtype=None)
    out_f32 = jax.block_until_ready(enc_f32.forward(tokens))
    ref = _reference(tokens, enc_f32.w_hwio, enc_f32.gamma, enc_f32.beta)
    assert out_f32.shape == (N,) + enc_f32.output_shape, (out_f32.shape, enc_f32.output_shape)
    err_f32 = float(jnp.max(jnp.abs(out_f32 - ref)))
    assert jnp.allclose(out_f32, ref, atol=1e-4, rtol=1e-4), err_f32

    # Default fast path: bf16 tokens/weights into the MXU, f32 accumulation + GN math.
    enc_bf16 = VisualEncoderPallas(num_patches=L, embed_dim=D, key=k_w)   # bf16 default
    out_bf16 = jax.block_until_ready(enc_bf16.forward(tokens))
    assert out_bf16.shape == out_f32.shape
    err_bf16 = float(jnp.max(jnp.abs(out_bf16 - ref)))
    assert err_bf16 < 0.25, err_bf16

    print("KERNEL_OK")
</pallas_src>

<mosaic_0001>
module attributes {stable_mosaic.version = 11 : i64} {
  func.func @_compression_kernel(%arg0: i32, %arg1: memref<1x64x32xf32, #tpu.memory_space<vmem>>, %arg2: memref<32x1152xf32, #tpu.memory_space<vmem>>, %arg3: memref<1x128xf32, #tpu.memory_space<vmem>>, %arg4: memref<1x128xf32, #tpu.memory_space<vmem>>, %arg5: memref<1x8x8x128xf32, #tpu.memory_space<vmem>>, %arg6: memref<1x8x8x128xf32, #tpu.memory_space<vmem>>) attributes {dimension_semantics = [#tpu.dimension_semantics<parallel>], iteration_bounds = array<i64: 2>, scalar_prefetch = 0 : i64, scratch_operands = 1 : i64, tpu.core_type = #tpu.core_type<tc>, window_params = [{transform_indices = @transform_0, window_bounds = array<i64: 1, 64, 32>}, {pipeline_mode = #tpu.pipeline_mode<synchronous>, transform_indices = @transform_1, window_bounds = array<i64: 32, 1152>}, {pipeline_mode = #tpu.pipeline_mode<synchronous>, transform_indices = @transform_2, window_bounds = array<i64: 1, 128>}, {pipeline_mode = #tpu.pipeline_mode<synchronous>, transform_indices = @transform_3, window_bounds = array<i64: 1, 128>}, {transform_indices = @transform_4, window_bounds = array<i64: 1, 8, 8, 128>}]} {
    %c0 = arith.constant 0 : index
    %c0_0 = arith.constant 0 : index
    %c0_1 = arith.constant 0 : index
    %0 = vector.load %arg1[%c0, %c0_0, %c0_1] : memref<1x64x32xf32, #tpu.memory_space<vmem>>, vector<1x64x32xf32>
    %1 = vector.shape_cast %0 : vector<1x64x32xf32> to vector<64x32xf32>
    %c0_2 = arith.constant 0 : index
    %c0_3 = arith.constant 0 : index
    %2 = vector.load %arg2[%c0_2, %c0_3] : memref<32x1152xf32, #tpu.memory_space<vmem>>, vector<32x1152xf32>
    %cst = arith.constant dense<0.000000e+00> : vector<64x1152xf32>
    %3 = tpu.matmul %1, %2, %cst {dimension_numbers = #tpu.dot_dimension_numbers<[1], [0], [0], [1], [0, 0, 1, 1], [], []>} : vector<64x32xf32>, vector<32x1152xf32>, vector<64x1152xf32> -> vector<64x1152xf32>
    %4 = tpu.iota {dimensions = array<i32: 2>} : vector<1x1x8x128xi32>
    %c0_i32 = arith.constant 0 : i32
    %5 = vector.broadcast %c0_i32 : i32 to vector<1x1x8x128xi32>
    %6 = arith.cmpi sgt, %4, %5 : vector<1x1x8x128xi32>
    %7 = arith.extui %6 : vector<1x1x8x128xi1> to vector<1x1x8x128xi32>
    %8 = arith.sitofp %7 : vector<1x1x8x128xi32> to vector<1x1x8x128xf32>
    %c7_i32 = arith.constant 7 : i32
    %9 = vector.broadcast %c7_i32 : i32 to vector<1x1x8x128xi32>
    %10 = arith.cmpi slt, %4, %9 : vector<1x1x8x128xi32>
    %11 = arith.extui %10 : vector<1x1x8x128xi1> to vector<1x1x8x128xi32>
    %12 = arith.sitofp %11 : vector<1x1x8x128xi32> to vector<1x1x8x128xf32>
    %13 = vector.extract_strided_slice %3 {offsets = [0, 512], sizes = [64, 128], strides = [1, 1]} : vector<64x1152xf32> to vector<64x128xf32>
    %14 = vector.shape_cast %13 : vector<64x128xf32> to vector<1x8x8x128xf32>
    %c0_4 = arith.constant 0 : index
    %c0_5 = arith.constant 0 : index
    %c0_6 = arith.constant 0 : index
    %c0_7 = arith.constant 0 : index
    %15 = vector.load %arg6[%c0_4, %c0_5, %c0_6, %c0_7] : memref<1x8x8x128xf32, #tpu.memory_space<vmem>>, vector<1x8x8x128xf32>
    tpu.vector_store %arg6[%c0_4, %c0_5, %c0_6, %c0_7], %14 {strides = array<i32>} : memref<1x8x8x128xf32, #tpu.memory_space<vmem>>, vector<1x8x8x128xf32>,
    %16 = vector.extract_strided_slice %3 {offsets = [0, 0], sizes = [64, 128], strides = [1, 1]} : vector<64x1152xf32> to vector<64x128xf32>
    %17 = vector.shape_cast %16 : vector<64x128xf32> to vector<1x8x8x128xf32>
    %c1_i32 = arith.constant 1 : i32
    %18 = tpu.dynamic_rotate %17 by %c1_i32 dim 2 : vector<1x8x8x128xf32>, i32 -> vector<1x8x8x128xf32>
    %19 = vector.broadcast %8 : vector<1x1x8x128xf32> to vector<1x8x8x128xf32>
    %20 = arith.mulf %18, %19 : vector<1x8x8x128xf32>
    %c0_8 = arith.constant 0 : index
    %c1 = arith.constant 1 : index
    %c0_9 = arith.constant 0 : index
    %c0_10 = arith.constant 0 : index
    %21 = vector.load %arg6[%c0_8, %c1, %c0_9, %c0_10] : memref<1x8x8x128xf32, #tpu.memory_space<vmem>>, vector<1x7x8x128xf32>
    %22 = vector.extract_strided_slice %20 {offsets = [0, 0, 0, 0], sizes = [1, 7, 8, 128], strides = [1, 1, 1, 1]} : vector<1x8x8x128xf32> to vector<1x7x8x128xf32>
    %23 = arith.addf %21, %22 : vector<1x7x8x128xf32>
    %c0_11 = arith.constant 0 : index
    %c1_12 = arith.constant 1 : index
    %c0_13 = arith.constant 0 : index
    %c0_14 = arith.constant 0 : index
    %24 = vector.load %arg6[%c0_11, %c1_12, %c0_13, %c0_14] : memref<1x8x8x128xf32, #tpu.memory_space<vmem>>, vector<1x7x8x128xf32>
    tpu.vector_store %arg6[%c0_11, %c1_12, %c0_13, %c0_14], %23 {strides = array<i32>} : memref<1x8x8x128xf32, #tpu.memory_space<vmem>>, vector<1x7x8x128xf32>,
    %25 = vector.extract_strided_slice %3 {offsets = [0, 128], sizes = [64, 128], strides = [1, 1]} : vector<64x1152xf32> to vector<64x128xf32>
    %26 = vector.shape_cast %25 : vector<64x128xf32> to vector<1x8x8x128xf32>
    %c0_15 = arith.constant 0 : index
    %c1_16 = arith.constant 1 : index
    %c0_17 = arith.constant 0 : index
    %c0_18 = arith.constant 0 : index
    %27 = vector.load %arg6[%c0_15, %c1_16, %c0_17, %c0_18] : memref<1x8x8x128xf32, #tpu.memory_space<vmem>>, vector<1x7x8x128xf32>
    %28 = vector.extract_strided_slice %26 {offsets = [0, 0, 0, 0], sizes = [1, 7, 8, 128], strides = [1, 1, 1, 1]} : vector<1x8x8x128xf32> to vector<1x7x8x128xf32>
    %29 = arith.addf %27, %28 : vector<1x7x8x128xf32>
    %c0_19 = arith.constant 0 : index
    %c1_20 = arith.constant 1 : index
    %c0_21 = arith.constant 0 : index
    %c0_22 = arith.constant 0 : index
    %30 = vector.load %arg6[%c0_19, %c1_20, %c0_21, %c0_22] : memref<1x8x8x128xf32, #tpu.memory_space<vmem>>, vector<1x7x8x128xf32>
    tpu.vector_store %arg6[%c0_19, %c1_20, %c0_21, %c0_22], %29 {strides = array<i32>} : memref<1x8x8x128xf32, #tpu.memory_space<vmem>>, vector<1x7x8x128xf32>,
    %31 = vector.extract_strided_slice %3 {offsets = [0, 256], sizes = [64, 128], strides = [1, 1]} : vector<64x1152xf32> to vector<64x128xf32>
    %32 = vector.shape_cast %31 : vector<64x128xf32> to vector<1x8x8x128xf32>
    %c7_i32_23 = arith.constant 7 : i32
    %33 = tpu.dynamic_rotate %32 by %c7_i32_23 dim 2 : vector<1x8x8x128xf32>, i32 -> vector<1x8x8x128xf32>
    %34 = vector.broadcast %12 : vector<1x1x8x128xf32> to vector<1x8x8x128xf32>
    %35 = arith.mulf %33, %34 : vector<1x8x8x128xf32>
    %c0_24 = arith.constant 0 : index
    %c1_25 = arith.constant 1 : index
    %c0_26 = arith.constant 0 : index
    %c0_27 = arith.constant 0 : index
    %36 = vector.load %arg6[%c0_24, %c1_25, %c0_26, %c0_27] : memref<1x8x8x128xf32, #tpu.memory_space<vmem>>, vector<1x7x8x128xf32>
    %37 = vector.extract_strided_slice %35 {offsets = [0, 0, 0, 0], sizes = [1, 7, 8, 128], strides = [1, 1, 1, 1]} : vector<1x8x8x128xf32> to vector<1x7x8x128xf32>
    %38 = arith.addf %36, %37 : vector<1x7x8x128xf32>
    %c0_28 = arith.constant 0 : index
    %c1_29 = arith.constant 1 : index
    %c0_30 = arith.constant 0 : index
    %c0_31 = arith.constant 0 : index
    %39 = vector.load %arg6[%c0_28, %c1_29, %c0_30, %c0_31] : memref<1x8x8x128xf32, #tpu.memory_space<vmem>>, vector<1x7x8x128xf32>
    tpu.vector_store %arg6[%c0_28, %c1_29, %c0_30, %c0_31], %38 {strides = array<i32>} : memref<1x8x8x128xf32, #tpu.memory_space<vmem>>, vector<1x7x8x128xf32>,
    %40 = vector.extract_strided_slice %3 {offsets = [0, 384], sizes = [64, 128], strides = [1, 1]} : vector<64x1152xf32> to vector<64x128xf32>
    %41 = vector.shape_cast %40 : vector<64x128xf32> to vector<1x8x8x128xf32>
    %c1_i32_32 = arith.constant 1 : i32
    %42 = tpu.dynamic_rotate %41 by %c1_i32_32 dim 2 : vector<1x8x8x128xf32>, i32 -> vector<1x8x8x128xf32>
    %43 = vector.broadcast %8 : vector<1x1x8x128xf32> to vector<1x8x8x128xf32>
    %44 = arith.mulf %42, %43 : vector<1x8x8x128xf32>
    %c0_33 = arith.constant 0 : index
    %c0_34 = arith.constant 0 : index
    %c0_35 = arith.constant 0 : index
    %c0_36 = arith.constant 0 : index
    %45 = vector.load %arg6[%c0_33, %c0_34, %c0_35, %c0_36] : memref<1x8x8x128xf32, #tpu.memory_space<vmem>>, vector<1x8x8x128xf32>
    %46 = arith.addf %45, %44 : vector<1x8x8x128xf32>
    %c0_37 = arith.constant 0 : index
    %c0_38 = arith.constant 0 : index
    %c0_39 = arith.constant 0 : index
    %c0_40 = arith.constant 0 : index
    %47 = vector.load %arg6[%c0_37, %c0_38, %c0_39, %c0_40] : memref<1x8x8x128xf32, #tpu.memory_space<vmem>>, vector<1x8x8x128xf32>
    tpu.vector_store %arg6[%c0_37, %c0_38, %c0_39, %c0_40], %46 {strides = array<i32>} : memref<1x8x8x128xf32, #tpu.memory_space<vmem>>, vector<1x8x8x128xf32>,
    %48 = vector.extract_strided_slice %3 {offsets = [0, 640], sizes = [64, 128], strides = [1, 1]} : vector<64x1152xf32> to vector<64x128xf32>
    %49 = vector.shape_cast %48 : vector<64x128xf32> to vector<1x8x8x128xf32>
    %c7_i32_41 = arith.constant 7 : i32
    %50 = tpu.dynamic_rotate %49 by %c7_i32_41 dim 2 : vector<1x8x8x128xf32>, i32 -> vector<1x8x8x128xf32>
    %51 = vector.broadcast %12 : vector<1x1x8x128xf32> to vector<1x8x8x128xf32>
    %52 = arith.mulf %50, %51 : vector<1x8x8x128xf32>
    %c0_42 = arith.constant 0 : index
    %c0_43 = arith.constant 0 : index
    %c0_44 = arith.constant 0 : index
    %c0_45 = arith.constant 0 : index
    %53 = vector.load %arg6[%c0_42, %c0_43, %c0_44, %c0_45] : memref<1x8x8x128xf32, #tpu.memory_space<vmem>>, vector<1x8x8x128xf32>
    %54 = arith.addf %53, %52 : vector<1x8x8x128xf32>
    %c0_46 = arith.constant 0 : index
    %c0_47 = arith.constant 0 : index
    %c0_48 = arith.constant 0 : index
    %c0_49 = arith.constant 0 : index
    %55 = vector.load %arg6[%c0_46, %c0_47, %c0_48, %c0_49] : memref<1x8x8x128xf32, #tpu.memory_space<vmem>>, vector<1x8x8x128xf32>
    tpu.vector_store %arg6[%c0_46, %c0_47, %c0_48, %c0_49], %54 {strides = array<i32>} : memref<1x8x8x128xf32, #tpu.memory_space<vmem>>, vector<1x8x8x128xf32>,
    %56 = vector.extract_strided_slice %3 {offsets = [0, 768], sizes = [64, 128], strides = [1, 1]} : vector<64x1152xf32> to vector<64x128xf32>
    %57 = vector.shape_cast %56 : vector<64x128xf32> to vector<1x8x8x128xf32>
    %c1_i32_50 = arith.constant 1 : i32
    %58 = tpu.dynamic_rotate %57 by %c1_i32_50 dim 2 : vector<1x8x8x128xf32>, i32 -> vector<1x8x8x128xf32>
    %59 = vector.broadcast %8 : vector<1x1x8x128xf32> to vector<1x8x8x128xf32>
    %60 = arith.mulf %58, %59 : vector<1x8x8x128xf32>
    %c0_51 = arith.constant 0 : index
    %c0_52 = arith.constant 0 : index
    %c0_53 = arith.constant 0 : index
    %c0_54 = arith.constant 0 : index
    %61 = vector.load %arg6[%c0_51, %c0_52, %c0_53, %c0_54] : memref<1x8x8x128xf32, #tpu.memory_space<vmem>>, vector<1x7x8x128xf32>
    %62 = vector.extract_strided_slice %60 {offsets = [0, 1, 0, 0], sizes = [1, 7, 8, 128], strides = [1, 1, 1, 1]} : vector<1x8x8x128xf32> to vector<1x7x8x128xf32>
    %63 = arith.addf %61, %62 : vector<1x7x8x128xf32>
    %c0_55 = arith.constant 0 : index
    %c0_56 = arith.constant 0 : index
    %c0_57 = arith.constant 0 : index
    %c0_58 = arith.constant 0 : index
    %64 = vector.load %arg6[%c0_55, %c0_56, %c0_57, %c0_58] : memref<1x8x8x128xf32, #tpu.memory_space<vmem>>, vector<1x7x8x128xf32>
    tpu.vector_store %arg6[%c0_55, %c0_56, %c0_57, %c0_58], %63 {strides = array<i32>} : memref<1x8x8x128xf32, #tpu.memory_space<vmem>>, vector<1x7x8x128xf32>,
    %65 = vector.extract_strided_slice %3 {offsets = [0, 896], sizes = [64, 128], strides = [1, 1]} : vector<64x1152xf32> to vector<64x128xf32>
    %66 = vector.shape_cast %65 : vector<64x128xf32> to vector<1x8x8x128xf32>
    %c0_59 = arith.constant 0 : index
    %c0_60 = arith.constant 0 : index
    %c0_61 = arith.constant 0 : index
    %c0_62 = arith.constant 0 : index
    %67 = vector.load %arg6[%c0_59, %c0_60, %c0_61, %c0_62] : memref<1x8x8x128xf32, #tpu.memory_space<vmem>>, vector<1x7x8x128xf32>
    %68 = vector.extract_strided_slice %66 {offsets = [0, 1, 0, 0], sizes = [1, 7, 8, 128], strides = [1, 1, 1, 1]} : vector<1x8x8x128xf32> to vector<1x7x8x128xf32>
    %69 = arith.addf %67, %68 : vector<1x7x8x128xf32>
    %c0_63 = arith.constant 0 : index
    %c0_64 = arith.constant 0 : index
    %c0_65 = arith.constant 0 : index
    %c0_66 = arith.constant 0 : index
    %70 = vector.load %arg6[%c0_63, %c0_64, %c0_65, %c0_66] : memref<1x8x8x128xf32, #tpu.memory_space<vmem>>, vector<1x7x8x128xf32>
    tpu.vector_store %arg6[%c0_63, %c0_64, %c0_65, %c0_66], %69 {strides = array<i32>} : memref<1x8x8x128xf32, #tpu.memory_space<vmem>>, vector<1x7x8x128xf32>,
    %71 = vector.extract_strided_slice %3 {offsets = [0, 1024], sizes = [64, 128], strides = [1, 1]} : vector<64x1152xf32> to vector<64x128xf32>
    %72 = vector.shape_cast %71 : vector<64x128xf32> to vector<1x8x8x128xf32>
    %c7_i32_67 = arith.constant 7 : i32
    %73 = tpu.dynamic_rotate %72 by %c7_i32_67 dim 2 : vector<1x8x8x128xf32>, i32 -> vector<1x8x8x128xf32>
    %74 = vector.broadcast %12 : vector<1x1x8x128xf32> to vector<1x8x8x128xf32>
    %75 = arith.mulf %73, %74 : vector<1x8x8x128xf32>
    %c0_68 = arith.constant 0 : index
    %c0_69 = arith.constant 0 : index
    %c0_70 = arith.constant 0 : index
    %c0_71 = arith.constant 0 : index
    %76 = vector.load %arg6[%c0_68, %c0_69, %c0_70, %c0_71] : memref<1x8x8x128xf32, #tpu.memory_space<vmem>>, vector<1x7x8x128xf32>
    %77 = vector.extract_strided_slice %75 {offsets = [0, 1, 0, 0], sizes = [1, 7, 8, 128], strides = [1, 1, 1, 1]} : vector<1x8x8x128xf32> to vector<1x7x8x128xf32>
    %78 = arith.addf %76, %77 : vector<1x7x8x128xf32>
    %c0_72 = arith.constant 0 : index
    %c0_73 = arith.constant 0 : index
    %c0_74 = arith.constant 0 : index
    %c0_75 = arith.constant 0 : index
    %79 = vector.load %arg6[%c0_72, %c0_73, %c0_74, %c0_75] : memref<1x8x8x128xf32, #tpu.memory_space<vmem>>, vector<1x7x8x128xf32>
    tpu.vector_store %arg6[%c0_72, %c0_73, %c0_74, %c0_75], %78 {strides = array<i32>} : memref<1x8x8x128xf32, #tpu.memory_space<vmem>>, vector<1x7x8x128xf32>,
    %c0_76 = arith.constant 0 : index
    %c0_77 = arith.constant 0 : index
    %c0_78 = arith.constant 0 : index
    %c0_79 = arith.constant 0 : index
    %80 = vector.load %arg6[%c0_76, %c0_77, %c0_78, %c0_79] : memref<1x8x8x128xf32, #tpu.memory_space<vmem>>, vector<1x8x8x128xf32>
    %cst_80 = arith.constant dense<0.000000e+00> : vector<1xf32>
    %81 = vector.multi_reduction <add>, %80, %cst_80 [1, 2, 3] : vector<1x8x8x128xf32> to vector<1xf32>
    %82 = vector.shape_cast %81 : vector<1xf32> to vector<1x1x1x1xf32>
    %83 = arith.mulf %80, %80 : vector<1x8x8x128xf32>
    %cst_81 = arith.constant dense<0.000000e+00> : vector<1xf32>
    %84 = vector.multi_reduction <add>, %83, %cst_81 [1, 2, 3] : vector<1x8x8x128xf32> to vector<1xf32>
    %85 = vector.shape_cast %84 : vector<1xf32> to vector<1x1x1x1xf32>
    %cst_82 = arith.constant 2.048000e+03 : f32
    %86 = vector.broadcast %cst_82 : f32 to vector<1x1x1x1xf32>
    %87 = arith.divf %82, %86 : vector<1x1x1x1xf32>
    %cst_83 = arith.constant 2.048000e+03 : f32
    %88 = vector.broadcast %cst_83 : f32 to vector<1x1x1x1xf32>
    %89 = arith.divf %85, %88 : vector<1x1x1x1xf32>
    %90 = arith.mulf %87, %87 : vector<1x1x1x1xf32>
    %91 = arith.subf %89, %90 : vector<1x1x1x1xf32>
    %cst_84 = arith.constant 0.000000e+00 : f32
    %92 = vector.broadcast %cst_84 : f32 to vector<1x1x1x1xf32>
    %93 = arith.maximumf %91, %92 : vector<1x1x1x1xf32>
    %cst_85 = arith.constant 9.99999974E-6 : f32
    %94 = vector.broadcast %cst_85 : f32 to vector<1x1x1x1xf32>
    %95 = arith.addf %93, %94 : vector<1x1x1x1xf32>
    %96 = math.rsqrt %95 : vector<1x1x1x1xf32>
    %c0_86 = arith.constant 0 : index
    %c0_87 = arith.constant 0 : index
    %97 = vector.load %arg3[%c0_86, %c0_87] : memref<1x128xf32, #tpu.memory_space<vmem>>, vector<1x128xf32>
    %98 = vector.shape_cast %97 : vector<1x128xf32> to vector<1x1x1x128xf32>
    %99 = vector.broadcast %96 : vector<1x1x1x1xf32> to vector<1x1x1x128xf32>
    %100 = arith.mulf %98, %99 : vector<1x1x1x128xf32>
    %c0_88 = arith.constant 0 : index
    %c0_89 = arith.constant 0 : index
    %101 = vector.load %arg4[%c0_88, %c0_89] : memref<1x128xf32, #tpu.memory_space<vmem>>, vector<1x128xf32>
    %102 = vector.shape_cast %101 : vector<1x128xf32> to vector<1x1x1x128xf32>
    %103 = vector.broadcast %87 : vector<1x1x1x1xf32> to vector<1x1x1x128xf32>
    %104 = arith.mulf %103, %100 : vector<1x1x1x128xf32>
    %105 = arith.subf %102, %104 : vector<1x1x1x128xf32>
    %106 = vector.broadcast %100 : vector<1x1x1x128xf32> to vector<1x8x8x128xf32>
    %107 = arith.mulf %80, %106 : vector<1x8x8x128xf32>
    %108 = vector.broadcast %105 : vector<1x1x1x128xf32> to vector<1x8x8x128xf32>
    %109 = arith.addf %107, %108 : vector<1x8x8x128xf32>
    %cst_90 = arith.constant 0.000000e+00 : f32
    %110 = vector.broadcast %cst_90 : f32 to vector<1x8x8x128xf32>
    %111 = arith.maximumf %109, %110 : vector<1x8x8x128xf32>
    %c0_91 = arith.constant 0 : index
    %c0_92 = arith.constant 0 : index
    %c0_93 = arith.constant 0 : index
    %c0_94 = arith.constant 0 : index
    %112 = vector.load %arg5[%c0_91, %c0_92, %c0_93, %c0_94] : memref<1x8x8x128xf32, #tpu.memory_space<vmem>>, vector<1x8x8x128xf32>
    tpu.vector_store %arg5[%c0_91, %c0_92, %c0_93, %c0_94], %111 {strides = array<i32>} : memref<1x8x8x128xf32, #tpu.memory_space<vmem>>, vector<1x8x8x128xf32>,
    return
  }
  func.func @transform_0(%arg0: i32) -> (i32, i32, i32) {
    %c0_i32 = arith.constant 0 : i32
    %c0_i32_0 = arith.constant 0 : i32
    %c0_i32_1 = arith.constant 0 : i32
    return %arg0, %c0_i32, %c0_i32_0 : i32, i32, i32
  }
  func.func @transform_1(%arg0: i32) -> (i32, i32) {
    %c0_i32 = arith.constant 0 : i32
    %c0_i32_0 = arith.constant 0 : i32
    %c0_i32_1 = arith.constant 0 : i32
    return %c0_i32, %c0_i32_0 : i32, i32
  }
  func.func @transform_2(%arg0: i32) -> (i32, i32) {
    %c0_i32 = arith.constant 0 : i32
    %c0_i32_0 = arith.constant 0 : i32
    %c0_i32_1 = arith.constant 0 : i32
    return %c0_i32, %c0_i32_0 : i32, i32
  }
  func.func @transform_3(%arg0: i32) -> (i32, i32) {
    %c0_i32 = arith.constant 0 : i32
    %c0_i32_0 = arith.constant 0 : i32
    %c0_i32_1 = arith.constant 0 : i32
    return %c0_i32, %c0_i32_0 : i32, i32
  }
  func.func @transform_4(%arg0: i32) -> (i32, i32, i32, i32) {
    %c0_i32 = arith.constant 0 : i32
    %c0_i32_0 = arith.constant 0 : i32
    %c0_i32_1 = arith.constant 0 : i32
    %c0_i32_2 = arith.constant 0 : i32
    return %arg0, %c0_i32, %c0_i32_0, %c0_i32_1 : i32, i32, i32, i32
  }
}

module attributes {stable_mosaic.version = 11 : i64} {
  func.func @_compression_kernel(%arg0: i32, %arg1: memref<1x64x32xf32, #tpu.memory_space<vmem>>, %arg2: memref<32x1152xf32, #tpu.memory_space<vmem>>, %arg3: memref<1x128xf32, #tpu.memory_space<vmem>>, %arg4: memref<1x128xf32, #tpu.memory_space<vmem>>, %arg5: memref<1x8x8x128xf32, #tpu.memory_space<vmem>>, %arg6: memref<1x8x8x128xf32, #tpu.memory_space<vmem>>) attributes {dimension_semantics = [#tpu.dimension_semantics<parallel>], iteration_bounds = array<i64: 2>, scalar_prefetch = 0 : i64, scratch_operands = 1 : i64, tpu.core_type = #tpu.core_type<tc>, window_params = [{transform_indices = @transform_0, window_bounds = array<i64: 1, 64, 32>}, {pipeline_mode = #tpu.pipeline_mode<synchronous>, transform_indices = @transform_1, window_bounds = array<i64: 32, 1152>}, {pipeline_mode = #tpu.pipeline_mode<synchronous>, transform_indices = @transform_2, window_bounds = array<i64: 1, 128>}, {pipeline_mode = #tpu.pipeline_mode<synchronous>, transform_indices = @transform_3, window_bounds = array<i64: 1, 128>}, {transform_indices = @transform_4, window_bounds = array<i64: 1, 8, 8, 128>}]} {
    %c0 = arith.constant 0 : index
    %c0_0 = arith.constant 0 : index
    %c0_1 = arith.constant 0 : index
    %0 = vector.load %arg1[%c0, %c0_0, %c0_1] : memref<1x64x32xf32, #tpu.memory_space<vmem>>, vector<1x64x32xf32>
    %1 = vector.shape_cast %0 : vector<1x64x32xf32> to vector<64x32xf32>
    %c0_2 = arith.constant 0 : index
    %c0_3 = arith.constant 0 : index
    %2 = vector.load %arg2[%c0_2, %c0_3] : memref<32x1152xf32, #tpu.memory_space<vmem>>, vector<32x1152xf32>
    %cst = arith.constant dense<0.000000e+00> : vector<64x1152xf32>
    %3 = tpu.matmul %1, %2, %cst {dimension_numbers = #tpu.dot_dimension_numbers<[1], [0], [0], [1], [0, 0, 1, 1], [], []>} : vector<64x32xf32>, vector<32x1152xf32>, vector<64x1152xf32> -> vector<64x1152xf32>
    %4 = tpu.iota {dimensions = array<i32: 2>} : vector<1x1x8x128xi32>
    %c0_i32 = arith.constant 0 : i32
    %5 = vector.broadcast %c0_i32 : i32 to vector<1x1x8x128xi32>
    %6 = arith.cmpi sgt, %4, %5 : vector<1x1x8x128xi32>
    %7 = arith.extui %6 : vector<1x1x8x128xi1> to vector<1x1x8x128xi32>
    %8 = arith.sitofp %7 : vector<1x1x8x128xi32> to vector<1x1x8x128xf32>
    %c7_i32 = arith.constant 7 : i32
    %9 = vector.broadcast %c7_i32 : i32 to vector<1x1x8x128xi32>
    %10 = arith.cmpi slt, %4, %9 : vector<1x1x8x128xi32>
    %11 = arith.extui %10 : vector<1x1x8x128xi1> to vector<1x1x8x128xi32>
    %12 = arith.sitofp %11 : vector<1x1x8x128xi32> to vector<1x1x8x128xf32>
    %13 = vector.extract_strided_slice %3 {offsets = [0, 512], sizes = [64, 128], strides = [1, 1]} : vector<64x1152xf32> to vector<64x128xf32>
    %14 = vector.shape_cast %13 : vector<64x128xf32> to vector<1x8x8x128xf32>
    %c0_4 = arith.constant 0 : index
    %c0_5 = arith.constant 0 : index
    %c0_6 = arith.constant 0 : index
    %c0_7 = arith.constant 0 : index
    %15 = vector.load %arg6[%c0_4, %c0_5, %c0_6, %c0_7] : memref<1x8x8x128xf32, #tpu.memory_space<vmem>>, vector<1x8x8x128xf32>
    tpu.vector_store %arg6[%c0_4, %c0_5, %c0_6, %c0_7], %14 {strides = array<i32>} : memref<1x8x8x128xf32, #tpu.memory_space<vmem>>, vector<1x8x8x128xf32>,
    %16 = vector.extract_strided_slice %3 {offsets = [0, 0], sizes = [64, 128], strides = [1, 1]} : vector<64x1152xf32> to vector<64x128xf32>
    %17 = vector.shape_cast %16 : vector<64x128xf32> to vector<1x8x8x128xf32>
    %c1_i32 = arith.constant 1 : i32
    %18 = tpu.dynamic_rotate %17 by %c1_i32 dim 2 : vector<1x8x8x128xf32>, i32 -> vector<1x8x8x128xf32>
    %19 = vector.broadcast %8 : vector<1x1x8x128xf32> to vector<1x8x8x128xf32>
    %20 = arith.mulf %18, %19 : vector<1x8x8x128xf32>
    %c0_8 = arith.constant 0 : index
    %c1 = arith.constant 1 : index
    %c0_9 = arith.constant 0 : index
    %c0_10 = arith.constant 0 : index
    %21 = vector.load %arg6[%c0_8, %c1, %c0_9, %c0_10] : memref<1x8x8x128xf32, #tpu.memory_space<vmem>>, vector<1x7x8x128xf32>
    %22 = vector.extract_strided_slice %20 {offsets = [0, 0, 0, 0], sizes = [1, 7, 8, 128], strides = [1, 1, 1, 1]} : vector<1x8x8x128xf32> to vector<1x7x8x128xf32>
    %23 = arith.addf %21, %22 : vector<1x7x8x128xf32>
    %c0_11 = arith.constant 0 : index
    %c1_12 = arith.constant 1 : index
    %c0_13 = arith.constant 0 : index
    %c0_14 = arith.constant 0 : index
    %24 = vector.load %arg6[%c0_11, %c1_12, %c0_13, %c0_14] : memref<1x8x8x128xf32, #tpu.memory_space<vmem>>, vector<1x7x8x128xf32>
    tpu.vector_store %arg6[%c0_11, %c1_12, %c0_13, %c0_14], %23 {strides = array<i32>} : memref<1x8x8x128xf32, #tpu.memory_space<vmem>>, vector<1x7x8x128xf32>,
    %25 = vector.extract_strided_slice %3 {offsets = [0, 128], sizes = [64, 128], strides = [1, 1]} : vector<64x1152xf32> to vector<64x128xf32>
    %26 = vector.shape_cast %25 : vector<64x128xf32> to vector<1x8x8x128xf32>
    %c0_15 = arith.constant 0 : index
    %c1_16 = arith.constant 1 : index
    %c0_17 = arith.constant 0 : index
    %c0_18 = arith.constant 0 : index
    %27 = vector.load %arg6[%c0_15, %c1_16, %c0_17, %c0_18] : memref<1x8x8x128xf32, #tpu.memory_space<vmem>>, vector<1x7x8x128xf32>
    %28 = vector.extract_strided_slice %26 {offsets = [0, 0, 0, 0], sizes = [1, 7, 8, 128], strides = [1, 1, 1, 1]} : vector<1x8x8x128xf32> to vector<1x7x8x128xf32>
    %29 = arith.addf %27, %28 : vector<1x7x8x128xf32>
    %c0_19 = arith.constant 0 : index
    %c1_20 = arith.constant 1 : index
    %c0_21 = arith.constant 0 : index
    %c0_22 = arith.constant 0 : index
    %30 = vector.load %arg6[%c0_19, %c1_20, %c0_21, %c0_22] : memref<1x8x8x128xf32, #tpu.memory_space<vmem>>, vector<1x7x8x128xf32>
    tpu.vector_store %arg6[%c0_19, %c1_20, %c0_21, %c0_22], %29 {strides = array<i32>} : memref<1x8x8x128xf32, #tpu.memory_space<vmem>>, vector<1x7x8x128xf32>,
    %31 = vector.extract_strided_slice %3 {offsets = [0, 256], sizes = [64, 128], strides = [1, 1]} : vector<64x1152xf32> to vector<64x128xf32>
    %32 = vector.shape_cast %31 : vector<64x128xf32> to vector<1x8x8x128xf32>
    %c7_i32_23 = arith.constant 7 : i32
    %33 = tpu.dynamic_rotate %32 by %c7_i32_23 dim 2 : vector<1x8x8x128xf32>, i32 -> vector<1x8x8x128xf32>
    %34 = vector.broadcast %12 : vector<1x1x8x128xf32> to vector<1x8x8x128xf32>
    %35 = arith.mulf %33, %34 : vector<1x8x8x128xf32>
    %c0_24 = arith.constant 0 : index
    %c1_25 = arith.constant 1 : index
    %c0_26 = arith.constant 0 : index
    %c0_27 = arith.constant 0 : index
    %36 = vector.load %arg6[%c0_24, %c1_25, %c0_26, %c0_27] : memref<1x8x8x128xf32, #tpu.memory_space<vmem>>, vector<1x7x8x128xf32>
    %37 = vector.extract_strided_slice %35 {offsets = [0, 0, 0, 0], sizes = [1, 7, 8, 128], strides = [1, 1, 1, 1]} : vector<1x8x8x128xf32> to vector<1x7x8x128xf32>
    %38 = arith.addf %36, %37 : vector<1x7x8x128xf32>
    %c0_28 = arith.constant 0 : index
    %c1_29 = arith.constant 1 : index
    %c0_30 = arith.constant 0 : index
    %c0_31 = arith.constant 0 : index
    %39 = vector.load %arg6[%c0_28, %c1_29, %c0_30, %c0_31] : memref<1x8x8x128xf32, #tpu.memory_space<vmem>>, vector<1x7x8x128xf32>
    tpu.vector_store %arg6[%c0_28, %c1_29, %c0_30, %c0_31], %38 {strides = array<i32>} : memref<1x8x8x128xf32, #tpu.memory_space<vmem>>, vector<1x7x8x128xf32>,
    %40 = vector.extract_strided_slice %3 {offsets = [0, 384], sizes = [64, 128], strides = [1, 1]} : vector<64x1152xf32> to vector<64x128xf32>
    %41 = vector.shape_cast %40 : vector<64x128xf32> to vector<1x8x8x128xf32>
    %c1_i32_32 = arith.constant 1 : i32
    %42 = tpu.dynamic_rotate %41 by %c1_i32_32 dim 2 : vector<1x8x8x128xf32>, i32 -> vector<1x8x8x128xf32>
    %43 = vector.broadcast %8 : vector<1x1x8x128xf32> to vector<1x8x8x128xf32>
    %44 = arith.mulf %42, %43 : vector<1x8x8x128xf32>
    %c0_33 = arith.constant 0 : index
    %c0_34 = arith.constant 0 : index
    %c0_35 = arith.constant 0 : index
    %c0_36 = arith.constant 0 : index
    %45 = vector.load %arg6[%c0_33, %c0_34, %c0_35, %c0_36] : memref<1x8x8x128xf32, #tpu.memory_space<vmem>>, vector<1x8x8x128xf32>
    %46 = arith.addf %45, %44 : vector<1x8x8x128xf32>
    %c0_37 = arith.constant 0 : index
    %c0_38 = arith.constant 0 : index
    %c0_39 = arith.constant 0 : index
    %c0_40 = arith.constant 0 : index
    %47 = vector.load %arg6[%c0_37, %c0_38, %c0_39, %c0_40] : memref<1x8x8x128xf32, #tpu.memory_space<vmem>>, vector<1x8x8x128xf32>
    tpu.vector_store %arg6[%c0_37, %c0_38, %c0_39, %c0_40], %46 {strides = array<i32>} : memref<1x8x8x128xf32, #tpu.memory_space<vmem>>, vector<1x8x8x128xf32>,
    %48 = vector.extract_strided_slice %3 {offsets = [0, 640], sizes = [64, 128], strides = [1, 1]} : vector<64x1152xf32> to vector<64x128xf32>
    %49 = vector.shape_cast %48 : vector<64x128xf32> to vector<1x8x8x128xf32>
    %c7_i32_41 = arith.constant 7 : i32
    %50 = tpu.dynamic_rotate %49 by %c7_i32_41 dim 2 : vector<1x8x8x128xf32>, i32 -> vector<1x8x8x128xf32>
    %51 = vector.broadcast %12 : vector<1x1x8x128xf32> to vector<1x8x8x128xf32>
    %52 = arith.mulf %50, %51 : vector<1x8x8x128xf32>
    %c0_42 = arith.constant 0 : index
    %c0_43 = arith.constant 0 : index
    %c0_44 = arith.constant 0 : index
    %c0_45 = arith.constant 0 : index
    %53 = vector.load %arg6[%c0_42, %c0_43, %c0_44, %c0_45] : memref<1x8x8x128xf32, #tpu.memory_space<vmem>>, vector<1x8x8x128xf32>
    %54 = arith.addf %53, %52 : vector<1x8x8x128xf32>
    %c0_46 = arith.constant 0 : index
    %c0_47 = arith.constant 0 : index
    %c0_48 = arith.constant 0 : index
    %c0_49 = arith.constant 0 : index
    %55 = vector.load %arg6[%c0_46, %c0_47, %c0_48, %c0_49] : memref<1x8x8x128xf32, #tpu.memory_space<vmem>>, vector<1x8x8x128xf32>
    tpu.vector_store %arg6[%c0_46, %c0_47, %c0_48, %c0_49], %54 {strides = array<i32>} : memref<1x8x8x128xf32, #tpu.memory_space<vmem>>, vector<1x8x8x128xf32>,
    %56 = vector.extract_strided_slice %3 {offsets = [0, 768], sizes = [64, 128], strides = [1, 1]} : vector<64x1152xf32> to vector<64x128xf32>
    %57 = vector.shape_cast %56 : vector<64x128xf32> to vector<1x8x8x128xf32>
    %c1_i32_50 = arith.constant 1 : i32
    %58 = tpu.dynamic_rotate %57 by %c1_i32_50 dim 2 : vector<1x8x8x128xf32>, i32 -> vector<1x8x8x128xf32>
    %59 = vector.broadcast %8 : vector<1x1x8x128xf32> to vector<1x8x8x128xf32>
    %60 = arith.mulf %58, %59 : vector<1x8x8x128xf32>
    %c0_51 = arith.constant 0 : index
    %c0_52 = arith.constant 0 : index
    %c0_53 = arith.constant 0 : index
    %c0_54 = arith.constant 0 : index
    %61 = vector.load %arg6[%c0_51, %c0_52, %c0_53, %c0_54] : memref<1x8x8x128xf32, #tpu.memory_space<vmem>>, vector<1x7x8x128xf32>
    %62 = vector.extract_strided_slice %60 {offsets = [0, 1, 0, 0], sizes = [1, 7, 8, 128], strides = [1, 1, 1, 1]} : vector<1x8x8x128xf32> to vector<1x7x8x128xf32>
    %63 = arith.addf %61, %62 : vector<1x7x8x128xf32>
    %c0_55 = arith.constant 0 : index
    %c0_56 = arith.constant 0 : index
    %c0_57 = arith.constant 0 : index
    %c0_58 = arith.constant 0 : index
    %64 = vector.load %arg6[%c0_55, %c0_56, %c0_57, %c0_58] : memref<1x8x8x128xf32, #tpu.memory_space<vmem>>, vector<1x7x8x128xf32>
    tpu.vector_store %arg6[%c0_55, %c0_56, %c0_57, %c0_58], %63 {strides = array<i32>} : memref<1x8x8x128xf32, #tpu.memory_space<vmem>>, vector<1x7x8x128xf32>,
    %65 = vector.extract_strided_slice %3 {offsets = [0, 896], sizes = [64, 128], strides = [1, 1]} : vector<64x1152xf32> to vector<64x128xf32>
    %66 = vector.shape_cast %65 : vector<64x128xf32> to vector<1x8x8x128xf32>
    %c0_59 = arith.constant 0 : index
    %c0_60 = arith.constant 0 : index
    %c0_61 = arith.constant 0 : index
    %c0_62 = arith.constant 0 : index
    %67 = vector.load %arg6[%c0_59, %c0_60, %c0_61, %c0_62] : memref<1x8x8x128xf32, #tpu.memory_space<vmem>>, vector<1x7x8x128xf32>
    %68 = vector.extract_strided_slice %66 {offsets = [0, 1, 0, 0], sizes = [1, 7, 8, 128], strides = [1, 1, 1, 1]} : vector<1x8x8x128xf32> to vector<1x7x8x128xf32>
    %69 = arith.addf %67, %68 : vector<1x7x8x128xf32>
    %c0_63 = arith.constant 0 : index
    %c0_64 = arith.constant 0 : index
    %c0_65 = arith.constant 0 : index
    %c0_66 = arith.constant 0 : index
    %70 = vector.load %arg6[%c0_63, %c0_64, %c0_65, %c0_66] : memref<1x8x8x128xf32, #tpu.memory_space<vmem>>, vector<1x7x8x128xf32>
    tpu.vector_store %arg6[%c0_63, %c0_64, %c0_65, %c0_66], %69 {strides = array<i32>} : memref<1x8x8x128xf32, #tpu.memory_space<vmem>>, vector<1x7x8x128xf32>,
    %71 = vector.extract_strided_slice %3 {offsets = [0, 1024], sizes = [64, 128], strides = [1, 1]} : vector<64x1152xf32> to vector<64x128xf32>
    %72 = vector.shape_cast %71 : vector<64x128xf32> to vector<1x8x8x128xf32>
    %c7_i32_67 = arith.constant 7 : i32
    %73 = tpu.dynamic_rotate %72 by %c7_i32_67 dim 2 : vector<1x8x8x128xf32>, i32 -> vector<1x8x8x128xf32>
    %74 = vector.broadcast %12 : vector<1x1x8x128xf32> to vector<1x8x8x128xf32>
    %75 = arith.mulf %73, %74 : vector<1x8x8x128xf32>
    %c0_68 = arith.constant 0 : index
    %c0_69 = arith.constant 0 : index
    %c0_70 = arith.constant 0 : index
    %c0_71 = arith.constant 0 : index
    %76 = vector.load %arg6[%c0_68, %c0_69, %c0_70, %c0_71] : memref<1x8x8x128xf32, #tpu.memory_space<vmem>>, vector<1x7x8x128xf32>
    %77 = vector.extract_strided_slice %75 {offsets = [0, 1, 0, 0], sizes = [1, 7, 8, 128], strides = [1, 1, 1, 1]} : vector<1x8x8x128xf32> to vector<1x7x8x128xf32>
    %78 = arith.addf %76, %77 : vector<1x7x8x128xf32>
    %c0_72 = arith.constant 0 : index
    %c0_73 = arith.constant 0 : index
    %c0_74 = arith.constant 0 : index
    %c0_75 = arith.constant 0 : index
    %79 = vector.load %arg6[%c0_72, %c0_73, %c0_74, %c0_75] : memref<1x8x8x128xf32, #tpu.memory_space<vmem>>, vector<1x7x8x128xf32>
    tpu.vector_store %arg6[%c0_72, %c0_73, %c0_74, %c0_75], %78 {strides = array<i32>} : memref<1x8x8x128xf32, #tpu.memory_space<vmem>>, vector<1x7x8x128xf32>,
    %c0_76 = arith.constant 0 : index
    %c0_77 = arith.constant 0 : index
    %c0_78 = arith.constant 0 : index
    %c0_79 = arith.constant 0 : index
    %80 = vector.load %arg6[%c0_76, %c0_77, %c0_78, %c0_79] : memref<1x8x8x128xf32, #tpu.memory_space<vmem>>, vector<1x8x8x128xf32>
    %cst_80 = arith.constant dense<0.000000e+00> : vector<1xf32>
    %81 = vector.multi_reduction <add>, %80, %cst_80 [1, 2, 3] : vector<1x8x8x128xf32> to vector<1xf32>
    %82 = vector.shape_cast %81 : vector<1xf32> to vector<1x1x1x1xf32>
    %83 = arith.mulf %80, %80 : vector<1x8x8x128xf32>
    %cst_81 = arith.constant dense<0.000000e+00> : vector<1xf32>
    %84 = vector.multi_reduction <add>, %83, %cst_81 [1, 2, 3] : vector<1x8x8x128xf32> to vector<1xf32>
    %85 = vector.shape_cast %84 : vector<1xf32> to vector<1x1x1x1xf32>
    %cst_82 = arith.constant 2.048000e+03 : f32
    %86 = vector.broadcast %cst_82 : f32 to vector<1x1x1x1xf32>
    %87 = arith.divf %82, %86 : vector<1x1x1x1xf32>
    %cst_83 = arith.constant 2.048000e+03 : f32
    %88 = vector.broadcast %cst_83 : f32 to vector<1x1x1x1xf32>
    %89 = arith.divf %85, %88 : vector<1x1x1x1xf32>
    %90 = arith.mulf %87, %87 : vector<1x1x1x1xf32>
    %91 = arith.subf %89, %90 : vector<1x1x1x1xf32>
    %cst_84 = arith.constant 0.000000e+00 : f32
    %92 = vector.broadcast %cst_84 : f32 to vector<1x1x1x1xf32>
    %93 = arith.maximumf %91, %92 : vector<1x1x1x1xf32>
    %cst_85 = arith.constant 9.99999974E-6 : f32
    %94 = vector.broadcast %cst_85 : f32 to vector<1x1x1x1xf32>
    %95 = arith.addf %93, %94 : vector<1x1x1x1xf32>
    %96 = math.rsqrt %95 : vector<1x1x1x1xf32>
    %c0_86 = arith.constant 0 : index
    %c0_87 = arith.constant 0 : index
    %97 = vector.load %arg3[%c0_86, %c0_87] : memref<1x128xf32, #tpu.memory_space<vmem>>, vector<1x128xf32>
    %98 = vector.shape_cast %97 : vector<1x128xf32> to vector<1x1x1x128xf32>
    %99 = vector.broadcast %96 : vector<1x1x1x1xf32> to vector<1x1x1x128xf32>
    %100 = arith.mulf %98, %99 : vector<1x1x1x128xf32>
    %c0_88 = arith.constant 0 : index
    %c0_89 = arith.constant 0 : index
    %101 = vector.load %arg4[%c0_88, %c0_89] : memref<1x128xf32, #tpu.memory_space<vmem>>, vector<1x128xf32>
    %102 = vector.shape_cast %101 : vector<1x128xf32> to vector<1x1x1x128xf32>
    %103 = vector.broadcast %87 : vector<1x1x1x1xf32> to vector<1x1x1x128xf32>
    %104 = arith.mulf %103, %100 : vector<1x1x1x128xf32>
    %105 = arith.subf %102, %104 : vector<1x1x1x128xf32>
    %106 = vector.broadcast %100 : vector<1x1x1x128xf32> to vector<1x8x8x128xf32>
    %107 = arith.mulf %80, %106 : vector<1x8x8x128xf32>
    %108 = vector.broadcast %105 : vector<1x1x1x128xf32> to vector<1x8x8x128xf32>
    %109 = arith.addf %107, %108 : vector<1x8x8x128xf32>
    %cst_90 = arith.constant 0.000000e+00 : f32
    %110 = vector.broadcast %cst_90 : f32 to vector<1x8x8x128xf32>
    %111 = arith.maximumf %109, %110 : vector<1x8x8x128xf32>
    %c0_91 = arith.constant 0 : index
    %c0_92 = arith.constant 0 : index
    %c0_93 = arith.constant 0 : index
    %c0_94 = arith.constant 0 : index
    %112 = vector.load %arg5[%c0_91, %c0_92, %c0_93, %c0_94] : memref<1x8x8x128xf32, #tpu.memory_space<vmem>>, vector<1x8x8x128xf32>
    tpu.vector_store %arg5[%c0_91, %c0_92, %c0_93, %c0_94], %111 {strides = array<i32>} : memref<1x8x8x128xf32, #tpu.memory_space<vmem>>, vector<1x8x8x128xf32>,
    return
  }
  func.func @transform_0(%arg0: i32) -> (i32, i32, i32) {
    %c0_i32 = arith.constant 0 : i32
    %c0_i32_0 = arith.constant 0 : i32
    %c0_i32_1 = arith.constant 0 : i32
    return %arg0, %c0_i32, %c0_i32_0 : i32, i32, i32
  }
  func.func @transform_1(%arg0: i32) -> (i32, i32) {
    %c0_i32 = arith.constant 0 : i32
    %c0_i32_0 = arith.constant 0 : i32
    %c0_i32_1 = arith.constant 0 : i32
    return %c0_i32, %c0_i32_0 : i32, i32
  }
  func.func @transform_2(%arg0: i32) -> (i32, i32) {
    %c0_i32 = arith.constant 0 : i32
    %c0_i32_0 = arith.constant 0 : i32
    %c0_i32_1 = arith.constant 0 : i32
    return %c0_i32, %c0_i32_0 : i32, i32
  }
  func.func @transform_3(%arg0: i32) -> (i32, i32) {
    %c0_i32 = arith.constant 0 : i32
    %c0_i32_0 = arith.constant 0 : i32
    %c0_i32_1 = arith.constant 0 : i32
    return %c0_i32, %c0_i32_0 : i32, i32
  }
  func.func @transform_4(%arg0: i32) -> (i32, i32, i32, i32) {
    %c0_i32 = arith.constant 0 : i32
    %c0_i32_0 = arith.constant 0 : i32
    %c0_i32_1 = arith.constant 0 : i32
    %c0_i32_2 = arith.constant 0 : i32
    return %arg0, %c0_i32, %c0_i32_0, %c0_i32_1 : i32, i32, i32, i32
  }
}

</mosaic_0001>

<bundles_post_ra>
// kernel: tpu_custom_call.1
= control target key start
LH: loop header
LB: loop body
LE: loop exit
PB: predicated region body
PF: predicated region fallthrough
CT: control target
= control target key end

     0   :  { %9 = vsyncpa [#allocation4], 0  ;;  %s2039_s0 = inlined_call_operand.vmem [shape: f32[2,64,32], index: 0, kind: input, shape index: {}]   ;;  %s2040_s1 = inlined_call_operand.hbm [shape: f32[32,1152], index: 1, kind: input, shape index: {}]   ;;  %s2041_s2 = inlined_call_operand.vmem [shape: f32[1,128], index: 2, kind: input, shape index: {}]   ;;  %s2042_s3 = inlined_call_operand.vmem [shape: f32[1,128], index: 3, kind: input, shape index: {}]   ;;  %s2043_s4 = inlined_call_operand.hbm [shape: f32[2,8,8,128], index: 4, kind: output, shape index: {}]  }
   0x1   :  { %10 = vsyncpa [#allocation5], 0 }
   0x2   :  { %12 = vsyncpa [#allocation5 + $0x1], 0  ;;  %s1580_s15 = smov 0   ;;  %s1582_s16 = smov 0  }
   0x3   :  { %s1584_s17 = smov 0   ;;  %s1586_s18 = smov 0  }
   0x4 LB: > { %s1601_s19 = sadd.s32 4294967295, %s1546_s18   ;;  %s1301_s20 = sadd.s32 4294967294, %s1546_s18   ;;  %s1546_s18 = sphi %s1586_s18, %s2051_s18   ;;  %s1542_s17 = sphi %s1584_s17, %s2050_s17   ;;  %s1538_s16 = sphi %s1582_s16, %s2049_s16   ;;  %s1534_s15 = sphi %s1580_s15, %s2048_s15  }
   0x5   : > { %s1605_s21 = sadd.s32 1, %s1546_s18   ;;  %s114_s22 = sadd.s32 1, %s1542_s17 }
   0x6   : > { %s111_s23 = ssub.s32 %s1546_s18, %s1605_s21  ;;  %p124_p0 = scmp.ne.s32.totalorder %s1542_s17, %s1538_s16 }
   0x7   : > { %p112_p1 = scmp.eq.s32.totalorder %s111_s23, 0  ;;  %p125_p2 = scmp.eq.s32.totalorder %s1601_s19, 1 }
   0x8   : > { %p130_p3 = scmp.ne.s32.totalorder %s1538_s16, %s1534_s15  ;;  %p131_p4 = scmp.eq.s32.totalorder %s1301_s20, 1 }
   0x9   : > { %s1616_s24 = scalar_select %p112_p1, %s1542_s17, %s114_s22  }
   0xa   : > { %p1618_p5 = por %p125_p2, %p124_p0  ;;  %p1622_p6 = por %p131_p4, %p130_p3 }
   0xb   : > { %p1302_p7 = scmp.ge.s32.totalorder %s1546_s18, 1  ;;  %p138_p8 = scmp.lt.s32.totalorder %s1546_s18, 3 }
   0xc   : > { %s2045_s26 = scalar_select %p1622_p6, 1, 0 }
   0xd   : > { %p1413_p9 = scmp.eq.s32.totalorder %s1601_s19, 0  ;;  %p1629_p10 = pnand %p1302_p7, %p138_p8 }
   0xe   : > { %s1548_s28 = smov [#allocation3]  }
   0xf   : > { %s150_s29 = sshll.u32 %s1548_s28, 4  ;;  %p1405_p11 = pneg %p1629_p10  ;;  %s151_s29 = int_to_ptr.vmem [resolvable:$true] %s150_s29 }
  0x10   : > { %s1467_s30 = scalar_lea.vmem %s151_s29, 4608  ;;  %p1475_p3 = scmp.lt.s32.totalorder %s151_s29, %s151_s29 }
  0x11   : > { %p1406_p12 = pnand %p1413_p9, %p1405_p11  ;;  %p1468_p0 = scmp.ne.s32.totalorder %s151_s29, %s1467_s30 }
  0x12   : > { %p1476_p4 = scmp.lt.s32.totalorder %s1467_s30, %s1467_s30 }
  0x13   : > { %p1458_p13 = pneg %p1406_p12 }
  0x14   : > { %p1477_p6 = por %p1476_p4, %p1475_p3 }
  0x15   : > { %p1470_p1 = pnand %p1468_p0, %p1458_p13 }
  0x17   : > { %p1471_p2 = pneg %p1470_p1 }
  0x19   : > { %p1478_p7 = pnand %p1477_p6, %p1471_p2 }
  0x1b   : > { %1481 = shalt.err (!%p1478_p7)
}
  0x1c   : > { %s1549_s5 = smov 1152   ;;  %s1550_s6 = smov 72  }
  0x1d   : > { %1408 = dma.hbm_to_vmem [thread:$0]  (!%p1406_p12), %s2040_s1, 4608, %s151_s29, [#allocation4], %s1549_s5, %s1549_s5, %s1550_s6  }
  0x1e   : > { %180 = sbr.rel (%p1629_p10) target bundleno = 529 (0x211), region = 36 }
  0x23   : > { %1525 = dma.done.wait (%p1413_p9), [#allocation4], 4608  }
  0x24   : > { %1527 = vsyncadd (%p1413_p9), [#allocation4], 4294962688  ;;  %p206_p8 = scmp.lt.s32.totalorder %s1601_s19, 1  ;;  %v1551_v0 = vmov 0.0   ;;  %v247_v1 = vld [vmem:[#allocation3 + $0xe0] sm:$0xff]  ;;  %v246_v2 = vld [vmem:[#allocation3 + $0xd8] sm:$0xff] }
  0x25   : > { %344 = vmatprep.mubr.f32.mxu0 %v1551_v0  ;;  %380 = vmatprep.mubr.f32.mxu1 %v1551_v0  ;;  %v238_v3 = vld [vmem:[#allocation3 + $0x98] sm:$0xff]  ;;  %v237_v4 = vld [vmem:[#allocation3 + $0x90] sm:$0xff]  ;;  %v228_v6 = vld [vmem:[#allocation3 + $0x48] sm:$0xff]  ;;  %vm255_vm0 = vcmask 261120   ;;  %s203_s22 = sand.u32 1, %s1538_s16   ;;  %s1358_s29 = sshll.u32 %s1601_s19, 10 }
  0x26   : > { %s207_s9 = scalar_select %p206_p8, %s1601_s19, 1  ;;  %304 = vmatprep.subr.mxu0 %v247_v1  ;;  %1391 = vmatprep.subr.mxu1 %v247_v1  ;;  %v229_v5 = vld [vmem:[#allocation3 + $0x50] sm:$0xff]  ;;  %v220_v7 = vld [vmem:[#allocation3 + $0x8] sm:$0xff]  ;;  %v219_v8 = vld [vmem:[#allocation3] sm:$0xff] }
  0x27   : > { %305 = vmatpush1.msra.mxu0 %v246_v2  ;;  %1395 = vmatpush1.msra.mxu1 %v246_v2  ;;  %v249_v11 = vld [vmem:[#allocation3 + $0xf0] sm:$0xff]  ;;  %v251_v12 = vld [vmem:[#allocation3 + $0x100] sm:$0xff]  ;;  %v248_v13 = vld [vmem:[#allocation3 + $0xe8] sm:$0xff]  ;;  %s1307_s28 = sshll.u32 %s203_s22, 6  ;;  %s1993_s8 = scalar_lea.hbm %s2043_s4, %s1358_s29 }
  0x28   : > { %s1357_s10 = sshll.u32 %s207_s9, 6  ;;  %306 = vmatprep.subr.mxu0 %v238_v3  ;;  %1392 = vmatprep.subr.mxu1 %v238_v3  ;;  %v250_v14 = vld [vmem:[#allocation3 + $0xf8] sm:$0xff]  ;;  %v240_v15 = vld [vmem:[#allocation3 + $0xa8] sm:$0xff]  ;;  %v239_v16 = vld [vmem:[#allocation3 + $0xa0] sm:$0xff]  ;;  %s205_s30 = scalar_lea.vmem [#allocation6], %s1307_s28 }
  0x29   : > { %s1653_s13 = scalar_lea.vmem %s2039_s0, %s1357_s10  ;;  %307 = vmatpush1.msra.mxu0 %v237_v4  ;;  %1396 = vmatpush1.msra.mxu1 %v237_v4  ;;  %v231_v19 = vld [vmem:[#allocation3 + $0x60] sm:$0xff]  ;;  %v242_v20 = vld [vmem:[#allocation3 + $0xb8] sm:$0xff]  ;;  %v221_v23 = vld [vmem:[#allocation3 + $0x10] sm:$0xff]  ;;  %s1227_s5 = sshll.u32 %s205_s30, 4  ;;  %s1995_s5 = int_to_ptr.vmem [resolvable:$true] %s1227_s5 }
  0x2a   : > { %308 = vmatprep.subr.mxu0 %v229_v5  ;;  %1393 = vmatprep.subr.mxu1 %v229_v5  ;;  %v1656_v9 = vld [vmem:[%s1653_s13] sm:$0xff]  ;;  %v1659_v10 = vld [vmem:[%s1653_s13 + $0x30] sm:$0xff]  ;;  %v1666_v17 = vld [vmem:[%s1653_s13 + $0x8] sm:$0xff]  ;;  %s1999_s19 = scalar_lea.sflag [#allocation5], %s203_s22  ;;  %s1482_s9 = scalar_lea.vmem %s1995_s5, 1024 }
  0x2b   : > { %309 = vmatpush1.msra.mxu0 %v228_v6  ;;  %1397 = vmatpush1.msra.mxu1 %v228_v6  ;;  %v1669_v18 = vld [vmem:[%s1653_s13 + $0x38] sm:$0xff]  ;;  %v241_v24 = vld [vmem:[#allocation3 + $0xb0] sm:$0xff]  ;;  %v252_v27 = vld [vmem:[#allocation3 + $0x108] sm:$0xff]  ;;  %v831_v6 = vlaneseq  ;;  %p1483_p6 = scmp.ne.s32.totalorder %s1995_s5, %s1482_s9  ;;  %s1552_s10 = smov [#allocation6]  }
  0x2c   : > { %310 = vmatprep.subr.mxu0 %v220_v7  ;;  %1394 = vmatprep.subr.mxu1 %v220_v7  ;;  %v230_v21 = vld [vmem:[#allocation3 + $0x58] sm:$0xff]  ;;  %v1679_v25 = vld [vmem:[%s1653_s13 + $0x10] sm:$0xff]  ;;  %v244_v29 = vld [vmem:[#allocation3 + $0xc8] sm:$0xff]  ;;  %s1486_s11 = sshll.u32 %s1552_s10, 4  ;;  %s1487_s11 = int_to_ptr.vmem [resolvable:$false] %s1486_s11 }
  0x2d   : > { %311 = vmatpush1.msra.mxu0 %v219_v8  ;;  %1398 = vmatpush1.msra.mxu1 %v219_v8  ;;  %v222_v22 = vld [vmem:[#allocation3 + $0x18] sm:$0xff]  ;;  %v253_v26 = vld [vmem:[#allocation3 + $0x110] sm:$0xff]  ;;  %v232_v31 = vld [vmem:[#allocation3 + $0x68] sm:$0xff]  ;;  %p1484_p9 = pnand %p1483_p6, %p1618_p5  ;;  %s1488_s12 = scalar_lea.vmem %s1487_s11, 2048 }
  0x2e   : > { %1310 = vmatmul.mubr.msk.f32.vlgmr.msra.gmra.mxu0 %vm255_vm0, %v1656_v9  ;;  %1316 = vmatmul.mubr.msk.f32.vlgmr.msra.gmra.mxu1 %vm255_vm0, %v1659_v10  ;;  %v233_v28 = vld [vmem:[#allocation3 + $0x70] sm:$0xff]  ;;  %v1688_v30 = vld [vmem:[%s1653_s13 + $0x18] sm:$0xff]  ;;  %v243_v32 = vld [vmem:[#allocation3 + $0xc0] sm:$0xff]  ;;  %p1489_p11 = scmp.lt.s32.totalorder %s1995_s5, %s1487_s11  ;;  %p1490_p12 = scmp.lt.s32.totalorder %s1488_s12, %s1482_s9 }
  0x2f   : > { %415 = vmatprep.subr.mxu1 %v249_v11  ;;  %527 = vmatprep.subr.mxu0 %v251_v12  ;;  %v224_v33 = vld [vmem:[#allocation3 + $0x28] sm:$0xff]  ;;  %v235_v34 = vld [vmem:[#allocation3 + $0x80] sm:$0xff]  ;;  %v234_v37 = vld [vmem:[#allocation3 + $0x78] sm:$0xff]  ;;  %v1820_v11 = vshrl.u32 %v831_v6, 7  ;;  %p1485_p10 = pneg %p1484_p9 }
  0x30   : > { %416 = vmatpush1.msra.mxu1 %v248_v13  ;;  %528 = vmatpush1.msra.mxu0 %v250_v14  ;;  %v1697_v35 = vld [vmem:[%s1653_s13 + $0x20] sm:$0xff]  ;;  %v254_v38 = vld [vmem:[#allocation3 + $0x118] sm:$0xff]  ;;  %v216_v40 = vld [vmem:[%s1653_s13 + $0x28] sm:$0xff]  ;;  %p1491_p13 = por %p1490_p12, %p1489_p11 }
  0x31   : > { %417 = vmatprep.subr.mxu1 %v240_v15  ;;  %350 = vmatprep.mubr.f32.mxu0 %v1551_v0  ;;  %v223_v36 = vld [vmem:[#allocation3 + $0x20] sm:$0xff]  ;;  %v226_v39 = vld [vmem:[#allocation3 + $0x38] sm:$0xff]  ;;  %v225_v41 = vld [vmem:[#allocation3 + $0x30] sm:$0xff]  ;;  %vm833_vm1 = vcmp.gt.s32.totalorder %v1820_v11, 0  ;;  %vm836_vm2 = vcmp.lt.s32.totalorder %v1820_v11, 7 }
  0x32   : > { %386 = vmatprep.mubr.f32.mxu1 %v1551_v0  ;;  %418 = vmatpush1.msra.mxu1 %v239_v16  ;;  %v245_v42 = vld [vmem:[#allocation3 + $0xd0] sm:$0xff]  ;;  %v236_v43 = vld [vmem:[#allocation3 + $0x88] sm:$0xff]  ;;  %v227_v44 = vld [vmem:[#allocation3 + $0x40] sm:$0xff]  ;;  %p1492_p0 = pnand %p1491_p13, %p1485_p10 }
  0x33   : > { %1311 = vmatmul.mubr.msk.f32.gmra.mxu0 %vm255_vm0, %v1666_v17  ;;  %1317 = vmatmul.mubr.msk.f32.gmra.mxu1 %vm255_vm0, %v1669_v18 }
  0x34   : > { %419 = vmatprep.subr.mxu1 %v231_v19  ;;  %529 = vmatprep.subr.mxu0 %v242_v20 }
  0x35   : > { %420 = vmatpush1.msra.mxu1 %v230_v21  ;;  %356 = vmatprep.mubr.f32.mxu0 %v1551_v0 }
  0x36   : > { %421 = vmatprep.subr.mxu1 %v222_v22  ;;  %455 = vmatprep.mubr.f32.mxu1 %v1551_v0  ;;  %v1837_v22 = vsel %vm833_vm1, 1.0, %v1551_v0 }
  0x37   : > { %422 = vmatpush1.msra.mxu1 %v221_v23  ;;  %530 = vmatpush1.msra.mxu0 %v241_v24 }
  0x38   : > { %1312 = vmatmul.mubr.msk.f32.gmra.mxu0 %vm255_vm0, %v1679_v25  ;;  %1318 = vmatmul.mubr.msk.f32.vlgmr.msra.gmra.mxu1 %vm255_vm0, %v1656_v9 }
  0x39   : > { %640 = vmatprep.subr.mxu1 %v253_v26  ;;  %362 = vmatprep.mubr.f32.mxu0 %v1551_v0 }
  0x3a   : > { %641 = vmatpush1.msra.mxu1 %v252_v27  ;;  %461 = vmatprep.mubr.f32.mxu1 %v1551_v0 }
  0x3b   : > { %531 = vmatprep.subr.mxu0 %v233_v28  ;;  %642 = vmatprep.subr.mxu1 %v244_v29  ;;  %v1841_v28 = vsel %vm836_vm2, 1.0, %v1551_v0 }
  0x3c   : > { %1313 = vmatmul.mubr.msk.f32.gmra.mxu0 %vm255_vm0, %v1688_v30  ;;  %1319 = vmatmul.mubr.msk.f32.gmra.mxu1 %vm255_vm0, %v1666_v17 }
  0x3d   : > { %532 = vmatpush1.msra.mxu0 %v232_v31  ;;  %368 = vmatprep.mubr.f32.mxu0 %v1551_v0 }
  0x3e   : > { %467 = vmatprep.mubr.f32.mxu1 %v1551_v0  ;;  %643 = vmatpush1.msra.mxu1 %v243_v32 }
  0x3f   : > { %533 = vmatprep.subr.mxu0 %v224_v33  ;;  %644 = vmatprep.subr.mxu1 %v235_v34 }
  0x40   : > { %1314 = vmatmul.mubr.msk.f32.gmra.mxu0 %vm255_vm0, %v1697_v35  ;;  %1320 = vmatmul.mubr.msk.f32.gmra.mxu1 %vm255_vm0, %v1679_v25 }
  0x41   : > { %374 = vmatprep.mubr.f32.mxu0 %v1551_v0  ;;  %473 = vmatprep.mubr.f32.mxu1 %v1551_v0 }
  0x42   : > { %534 = vmatpush1.msra.mxu0 %v223_v36  ;;  %645 = vmatpush1.msra.mxu1 %v234_v37 }
  0x43   : > { %1371 = vmatprep.subr.mxu0 %v254_v38  ;;  %646 = vmatprep.subr.mxu1 %v226_v39 }
  0x44   : > { %1315 = vmatmul.mubr.msk.f32.gmra.mxu0 %vm255_vm0, %v216_v40  ;;  %1321 = vmatmul.mubr.msk.f32.gmra.mxu1 %vm255_vm0, %v1688_v30 }
  0x45   : > { %479 = vmatprep.mubr.f32.mxu1 %v1551_v0  ;;  %567 = vmatprep.mubr.f32.mxu0 %v1551_v0 }
  0x46   : > { %647 = vmatpush1.msra.mxu1 %v225_v41 }
  0x48   : > { %1322 = vmatmul.mubr.msk.f32.gmra.mxu1 %vm255_vm0, %v1697_v35  ;;  %1326 = vmatmul.mubr.msk.f32.vlgmr.msra.gmra.mxu0 %vm255_vm0, %v1656_v9 }
  0x49   : > { %1372 = vmatpush3.msra.mxu0 %v254_v38  ;;  %485 = vmatprep.mubr.f32.mxu1 %v1551_v0 }
  0x4a   : > { %573 = vmatprep.mubr.f32.mxu0 %v1551_v0  ;;  %1373 = vmatprep.subr.mxu0 %v245_v42 }
  0x4b   : > { %1374 = vmatpush3.msra.mxu0 %v245_v42 }
  0x4c   : > { %1323 = vmatmul.mubr.msk.f32.gmra.mxu1 %vm255_vm0, %v216_v40  ;;  %1327 = vmatmul.mubr.msk.f32.gmra.mxu0 %vm255_vm0, %v1666_v17 }
  0x4d   : > { %491 = vmatprep.mubr.f32.mxu1 %v1551_v0  ;;  %579 = vmatprep.mubr.f32.mxu0 %v1551_v0 }
  0x4e   : > { %1375 = vmatprep.subr.mxu0 %v236_v43 }
  0x4f   : > { %1376 = vmatpush3.msra.mxu0 %v236_v43 }
  0x50   : > { %1324 = vmatmul.mubr.msk.f32.gmra.mxu1 %vm255_vm0, %v1659_v10  ;;  %1328 = vmatmul.mubr.msk.f32.gmra.mxu0 %vm255_vm0, %v1679_v25 }
  0x51   : > { %497 = vmatprep.mubr.f32.mxu1 %v1551_v0  ;;  %585 = vmatprep.mubr.f32.mxu0 %v1551_v0 }
  0x52   : > { %1377 = vmatprep.subr.mxu0 %v227_v44 }
  0x53   : > { %1378 = vmatpush3.msra.mxu0 %v227_v44 }
  0x54   : > { %1325 = vmatmul.mubr.msk.f32.gmra.mxu1 %vm255_vm0, %v1669_v18  ;;  %1329 = vmatmul.mubr.msk.f32.gmra.mxu0 %vm255_vm0, %v1688_v30 }
  0x55   : > { %591 = vmatprep.mubr.f32.mxu0 %v1551_v0  ;;  %680 = vmatprep.mubr.f32.mxu1 %v1551_v0 }
  0x58   : > { %1330 = vmatmul.mubr.msk.f32.gmra.mxu0 %vm255_vm0, %v1697_v35  ;;  %1334 = vmatmul.mubr.msk.f32.vlgmr.msra.gmra.mxu1 %vm255_vm0, %v1656_v9 }
  0x59   : > { %597 = vmatprep.mubr.f32.mxu0 %v1551_v0  ;;  %684 = vmatprep.mubr.f32.mxu1 %v1551_v0 }
  0x5c   : > { %1331 = vmatmul.mubr.msk.f32.gmra.mxu0 %vm255_vm0, %v216_v40  ;;  %1335 = vmatmul.mubr.msk.f32.gmra.mxu1 %vm255_vm0, %v1666_v17 }
  0x5d   : > { %603 = vmatprep.mubr.f32.mxu0 %v1551_v0  ;;  %690 = vmatprep.mubr.f32.mxu1 %v1551_v0 }
  0x60   : > { %1332 = vmatmul.mubr.msk.f32.gmra.mxu0 %vm255_vm0, %v1659_v10  ;;  %1336 = vmatmul.mubr.msk.f32.gmra.mxu1 %vm255_vm0, %v1679_v25 }
  0x61   : > { %609 = vmatprep.mubr.f32.mxu0 %v1551_v0  ;;  %696 = vmatprep.mubr.f32.mxu1 %v1551_v0 }
  0x64   : > { %1333 = vmatmul.mubr.msk.f32.gmra.mxu0 %vm255_vm0, %v1669_v18  ;;  %1337 = vmatmul.mubr.msk.f32.gmra.mxu1 %vm255_vm0, %v1688_v30 }
  0x65   : > { %702 = vmatprep.mubr.f32.mxu1 %v1551_v0  ;;  %1379 = vmatprep.mubr.msk.f32.mxu0 %vm255_vm0, %v1656_v9 }
  0x68   : > { %1338 = vmatmul.mubr.msk.f32.gmra.mxu1 %vm255_vm0, %v1697_v35  ;;  %1380 = vmatmul.mubr.msk.f32.vlgmr.msra.gmra.mxu0 %vm255_vm0, %v1666_v17 }
  0x69   : > { %708 = vmatprep.mubr.f32.mxu1 %v1551_v0  ;;  %1382 = vmatprep.mubr.msk.f32.mxu0 %vm255_vm0, %v1679_v25 }
  0x6c   : > { %1339 = vmatmul.mubr.msk.f32.gmra.mxu1 %vm255_vm0, %v216_v40  ;;  %1383 = vmatmul.mubr.msk.f32.gmra.mxu0 %vm255_vm0, %v1688_v30 }
  0x6d   : > { %714 = vmatprep.mubr.f32.mxu1 %v1551_v0  ;;  %1385 = vmatprep.mubr.msk.f32.mxu0 %vm255_vm0, %v1697_v35 }
  0x70   : > { %1340 = vmatmul.mubr.msk.f32.gmra.mxu1 %vm255_vm0, %v1659_v10  ;;  %1386 = vmatmul.mubr.msk.f32.gmra.mxu0 %vm255_vm0, %v216_v40 }
  0x71   : > { %720 = vmatprep.mubr.f32.mxu1 %v1551_v0  ;;  %1388 = vmatprep.mubr.msk.f32.mxu0 %vm255_vm0, %v1659_v10 }
  0x74   : > { %1341 = vmatmul.mubr.msk.f32.gmra.mxu1 %vm255_vm0, %v1669_v18  ;;  %1389 = vmatmul.mubr.msk.f32.gmra.mxu0 %vm255_vm0, %v1669_v18 }
  0xee   : > { %v346_v45 = vpop.f32.mrf.mxu0  ;;  %v1782_v46 = vpop.f32.mrf.mxu1 }
  0xef   : > { %v847_v18 = vrot.slane %v346_v45, 7  ;;  %v853_v25 = vrot.slane %v1782_v46, 7 }
  0xf0   : > { %v1784_v47 = vpop.f32.mrf.mxu0  ;;  %v1786_v48 = vpop.f32.mrf.mxu1 }
  0xf1   : > { %v854_v30 = vmul.f32 %v1837_v22, %v847_v18  ;;  %v860_v42 = vmul.f32 %v1837_v22, %v853_v25 }
  0xf3   : > { %v352_v49 = vpop.f32.mrf.mxu0  ;;  %v388_v50 = vpop.f32.mrf.mxu1 }
  0xf4   : > { %v848_v19 = vrot.slane %v352_v49, 7 }
  0xf5   : > { %v1788_v51 = vpop.f32.mrf.mxu0  ;;  %v389_v52 = vpop.f32.mrf.mxu1 }
  0xf6   : > { %v855_v31 = vmul.f32 %v1837_v22, %v848_v19 }
  0xf8   : > { %v358_v53 = vpop.f32.mrf.mxu0  ;;  %v457_v54 = vpop.f32.mrf.mxu1 }
  0xf9   : > { %v849_v26 = vrot.slane %v358_v53, 7  ;;  %v904_v27 = vrot.slane %v457_v54, 1 }
  0xfa   : > { %v1790_v55 = vpop.f32.mrf.mxu0  ;;  %v459_v56 = vpop.f32.mrf.mxu1 }
  0xfb   : > { %v939_v29 = vrot.slane %v459_v56, 7  ;;  %v911_v40 = vmul.f32 %v1841_v28, %v904_v27  ;;  %v856_v41 = vmul.f32 %v1837_v22, %v849_v26 }
  0xfc   : > { %v364_v57 = vpop.f32.mrf.mxu0  ;;  %v463_v58 = vpop.f32.mrf.mxu1 }
  0xfd   : > { %v850_v34 = vrot.slane %v364_v57, 7  ;;  %v905_v35 = vrot.slane %v463_v58, 1  ;;  %v947_v46 = vmul.f32 %v1837_v22, %v939_v29 }
  0xfe   : > { %v1792_v59 = vpop.f32.mrf.mxu0  ;;  %v1794_v60 = vpop.f32.mrf.mxu1 }
  0xff   : > { %v940_v0 = vrot.slane %v1794_v60, 7  ;;  %v857_v56 = vmul.f32 %v1837_v22, %v850_v34  ;;  %v912_v57 = vmul.f32 %v1841_v28, %v905_v35 }
 0x100   : > { %v1796_v61 = vpop.f32.mrf.mxu0  ;;  %v1798_v62 = vpop.f32.mrf.mxu1 }
 0x101   : > { %v851_v43 = vrot.slane %v1796_v61, 7  ;;  %v906_v44 = vrot.slane %v1798_v62, 1  ;;  %v948_v6 = vmul.f32 %v1837_v22, %v940_v0 }
 0x102   : > { %v1800_v63 = vpop.f32.mrf.mxu0  ;;  %v1802_v1 = vpop.f32.mrf.mxu1 }
 0x103   : > { %v941_v45 = vrot.slane %v1802_v1, 7 }
 0x104   : > { %v1804_v2 = vpop.f32.mrf.mxu0  ;;  %v1806_v3 = vpop.f32.mrf.mxu1 }
 0x105   : > { %v852_v52 = vrot.slane %v1804_v2, 7  ;;  %v907_v53 = vrot.slane %v1806_v3, 1 }
 0x106   : > { %v1808_v4 = vpop.f32.mrf.mxu0  ;;  %v1810_v5 = vpop.f32.mrf.mxu1 }
 0x107   : > { %v942_v58 = vrot.slane %v1810_v5, 7  ;;  %v858_v5 = vmul.f32 %v1837_v22, %v851_v43  ;;  %v914_v19 = vmul.f32 %v1841_v28, %v907_v53 }
 0x108   : > { %v1812_v7 = vpop.f32.mrf.mxu1  ;;  %v1814_v8 = vpop.f32.mrf.mxu0 }
 0x109   : > { %v908_v2 = vrot.slane %v1812_v7, 1  ;;  %v1883_v25 = vmul.f32 %v1837_v22, %v942_v58  ;;  %v963_v34 = vadd.f32 %v947_v46, %v1814_v8 }
 0x10a   : > { %v1816_v9 = vpop.f32.mrf.mxu1  ;;  %v1818_v10 = vpop.f32.mrf.mxu0 }
 0x10b   : > { %v979_v54 = vrot.slane %v1818_v10, 1  ;;  %v943_v3 = vrot.slane %v1816_v9, 7  ;;  %v913_v10 = vmul.f32 %v1841_v28, %v906_v44  ;;  %v859_v9 = vmul.f32 %v1837_v22, %v852_v52 }
 0x10c   : > { %v1822_v12 = vpop.f32.mrf.mxu1  ;;  %v575_v13 = vpop.f32.mrf.mxu0 }
 0x10d   : > { %v869_v36 = vadd.f32 %v854_v30, %v575_v13  ;;  %v909_v18 = vrot.slane %v1822_v12, 1  ;;  %v951_v35 = vmul.f32 %v1837_v22, %v943_v3 }
 0x10e   : > { %v1824_v14 = vpop.f32.mrf.mxu1  ;;  %v1826_v15 = vpop.f32.mrf.mxu0 }
 0x10f   : > { %v890_v60 = vadd.f32 %v869_v36, %v1784_v47  ;;  %v944_v7 = vrot.slane %v1824_v14, 7  ;;  %v916_v14 = vmul.f32 %v1841_v28, %v909_v18 }
 0x110   : > { %v1829_v16 = vpop.f32.mrf.mxu1  ;;  %v581_v17 = vpop.f32.mrf.mxu0 }
 0x111   : > { %v870_v37 = vadd.f32 %v855_v31, %v581_v17  ;;  %v949_v17 = vmul.f32 %v1837_v22, %v941_v45  ;;  %v925_v26 = vadd.f32 %v911_v40, %v890_v60  ;;  %v915_v31 = vmul.f32 %v1841_v28, %v908_v2 }
 0x112   : > { %v1831_v20 = vpop.f32.mrf.mxu1  ;;  %v1833_v21 = vpop.f32.mrf.mxu0  ;;  %v1897_v0 = vmul.f32 %v1837_v22, %v944_v7  ;;  %v910_v8 = vrot.slane %v1829_v16, 1 }
 0x113   : > { %v891_v61 = vadd.f32 %v870_v37, %v1788_v51  ;;  %v980_v37 = vrot.slane %v1826_v15, 1  ;;  %v964_v45 = vadd.f32 %v948_v6, %v925_v26 }
 0x114   : > { %v499_v23 = vpop.f32.mrf.mxu1  ;;  %v587_v24 = vpop.f32.mrf.mxu0 }
 0x115   : > { %v987_v23 = vmul.f32 %v1841_v28, %v979_v54  ;;  %v926_v27 = vadd.f32 %v912_v57, %v891_v61  ;;  %v871_v12 = vadd.f32 %v856_v41, %v587_v24 }
 0x116   : > { %v1845_v32 = vpop.f32.mrf.mxu1  ;;  %v1847_v33 = vpop.f32.mrf.mxu0 }
 0x117   : > { %v1003_v43 = vadd.f32 %v987_v23, %v963_v34  ;;  %v892_v44 = vadd.f32 %v871_v12, %v1790_v55  ;;  %v982_v55 = vrot.slane %v1847_v33, 1  ;;  %v946_v26 = vrot.slane %v1845_v32, 7 }
 0x118   : > { %v593_v38 = vpop.f32.mrf.mxu0  ;;  %v682_v39 = vpop.f32.mrf.mxu1 }
 0x119   : > { %v872_v13 = vadd.f32 %v857_v56, %v593_v38  ;;  %v981_v38 = vrot.slane %v1833_v21, 1  ;;  %v965_v21 = vadd.f32 %v949_v17, %v926_v27  ;;  %v988_v56 = vmul.f32 %v1841_v28, %v980_v37 }
 0x11a   : > { %v1857_v49 = vpop.f32.mrf.mxu0  ;;  %v683_v50 = vpop.f32.mrf.mxu1  ;;  %v927_v2 = vadd.f32 %v913_v10, %v892_v44  ;;  %v990_v10 = vmul.f32 %v1841_v28, %v982_v55 }
 0x11b   : > { %v893_v36 = vadd.f32 %v872_v13, %v1792_v59  ;;  %v945_v59 = vrot.slane %v1831_v20, 7  ;;  %v989_v57 = vmul.f32 %v1841_v28, %v981_v38  ;;  %v983_v61 = vrot.slane %v1857_v49, 1 }
 0x11c   : > { %v599_v62 = vpop.f32.mrf.mxu0  ;;  %v686_v1 = vpop.f32.mrf.mxu1  ;;  %v1004_v33 = vadd.f32 %v988_v56, %v964_v45 }
 0x11d   : > { %v1019_v39 = vrot.slane %v686_v1, 7  ;;  %v873_v41 = vadd.f32 %v858_v5, %v599_v62  ;;  %v928_v50 = vadd.f32 %v914_v19, %v893_v36  ;;  %v953_v6 = vmul.f32 %v1837_v22, %v945_v59 }
 0x11e   : > { %v1874_v47 = vpop.f32.mrf.mxu0  ;;  %v1876_v51 = vpop.f32.mrf.mxu1  ;;  %v1005_v5 = vadd.f32 %v989_v57, %v965_v21  ;;  %v991_v27 = vmul.f32 %v1841_v28, %v983_v61 }
 0x11f   : > { %v1026_v16 = vmul.f32 %v1837_v22, %v1019_v39  ;;  %v894_v62 = vadd.f32 %v873_v41, %v1800_v63  ;;  %v967_v49 = vadd.f32 %v951_v35, %v928_v50  ;;  %v966_v35 = vadd.f32 %v1883_v25, %v927_v2 }
 0x120   : > { %v605_v29 = vpop.f32.mrf.mxu0  ;;  %v692_v30 = vpop.f32.mrf.mxu1 }
 0x121   : > { %v1020_v52 = vrot.slane %v692_v30, 7  ;;  %v874_v58 = vadd.f32 %v859_v9, %v605_v29  ;;  %v1040_v19 = vadd.f32 %v1026_v16, %v1003_v43  ;;  %v929_v12 = vadd.f32 %v915_v31, %v894_v62 }
 0x122   : > { %v1892_v40 = vpop.f32.mrf.mxu0  ;;  %v1894_v24 = vpop.f32.mrf.mxu1  ;;  %v984_v29 = vrot.slane %v1874_v47, 1 }
 0x123   : > { %v1027_v18 = vmul.f32 %v1837_v22, %v1020_v52  ;;  %v895_v63 = vadd.f32 %v874_v58, %v1808_v4  ;;  %v1061_v41 = vadd.f32 %v1040_v19, %v1876_v51  ;;  %v985_v59 = vrot.slane %v1892_v40, 1 }
 0x124   : > { %v611_v15 = vpop.f32.mrf.mxu0  ;;  %v698_v46 = vpop.f32.mrf.mxu1  ;;  %v992_v21 = vmul.f32 %v1841_v28, %v984_v29  ;;  %v1006_v51 = vadd.f32 %v990_v10, %v966_v35 }
 0x125   : > { %v875_v53 = vadd.f32 %v860_v42, %v611_v15  ;;  %v1021_v54 = vrot.slane %v698_v46, 7  ;;  %v1914_v42 = vmul.f32 %v1841_v28, %v910_v8  ;;  %v1041_v37 = vadd.f32 %v1027_v18, %v1004_v33 }
 0x126   : > { %v1905_v60 = vpop.f32.mrf.mxu0  ;;  %v700_v20 = vpop.f32.mrf.mxu1  ;;  %v1007_v8 = vadd.f32 %v991_v27, %v967_v49  ;;  %v930_v43 = vadd.f32 %v916_v14, %v895_v63  ;;  %v968_v46 = vadd.f32 %v1897_v0, %v929_v12 }
 0x127   : > { %v1911_v1 = vadd.f32 %v875_v53, %v1786_v48  ;;  %v1028_v3 = vmul.f32 %v1837_v22, %v1021_v54  ;;  %v1062_v40 = vadd.f32 %v1041_v37, %v1894_v24 }
 0x128   : > { %v704_v13 = vpop.f32.mrf.mxu1  ;;  %v1381_v17 = vpop.f32.mrf.mxu0  ;;  %v969_v62 = vadd.f32 %v953_v6, %v930_v43  ;;  %v954_v43 = vmul.f32 %v1837_v22, %v946_v26 }
 0x129   : > { %v1022_v48 = vrot.slane %v704_v13, 7  ;;  %v1075_v23 = vrot.slane %v1381_v17, 1  ;;  %v1042_v30 = vadd.f32 %v1028_v3, %v1005_v5  ;;  %v1008_v13 = vadd.f32 %v992_v21, %v968_v46 }
 0x12a   : > { %v706_v7 = vpop.f32.mrf.mxu1  ;;  %v793_v9 = vpop.f32.mrf.mxu0 }
 0x12b   : > { %v1082_v34 = vmul.f32 %v1841_v28, %v1075_v23  ;;  %v1029_v31 = vmul.f32 %v1837_v22, %v1022_v48  ;;  %v1063_v50 = vadd.f32 %v1042_v30, %v700_v20  ;;  %v993_v20 = vmul.f32 %v1841_v28, %v985_v59 }
 0x12c   : > { %v710_v36 = vpop.f32.mrf.mxu1  ;;  %v1384_v4 = vpop.f32.mrf.mxu0  ;;  %v986_v59 = vrot.slane %v1905_v60, 1 }
 0x12d   : > { %v1023_v38 = vrot.slane %v710_v36, 7  ;;  %v1077_v39 = vrot.slane %v1384_v4, 1  ;;  %v1933_v52 = vadd.f32 %v1082_v34, %v1061_v41  ;;  %v1043_v16 = vadd.f32 %v1029_v31, %v1006_v51 }
 0x12e   : > { %v712_v44 = vpop.f32.mrf.mxu1  ;;  %v802_v47 = vpop.f32.mrf.mxu0  ;;  %v1009_v27 = vadd.f32 %v993_v20, %v969_v62  ;;  %v931_v36 = vadd.f32 %v1914_v42, %v1911_v1  ;;  %v994_v60 = vmul.f32 %v1841_v28, %v986_v59 }
 0x12f   : > { %v1030_v45 = vmul.f32 %v1837_v22, %v1023_v38  ;;  %v1084_v15 = vmul.f32 %v1841_v28, %v1077_v39  ;;  %v1076_v25 = vrot.slane %v802_v47, 1  ;;  %v1133_v24 = vmul.f32 %v1933_v52, %v1933_v52 }
 0x130   : > { %v716_v14 = vpop.f32.mrf.mxu1  ;;  %v1387_v53 = vpop.f32.mrf.mxu0  ;;  %v1064_v23 = vadd.f32 %v1043_v16, %v706_v7 }
 0x131   : > { %v1044_v54 = vadd.f32 %v1030_v45, %v1007_v8  ;;  %v1083_v56 = vmul.f32 %v1841_v28, %v1076_v25  ;;  %v1024_v57 = vrot.slane %v716_v14, 7  ;;  %v1937_v58 = vadd.f32 %v1084_v15, %v1063_v50 }
 0x132   : > { %v1079_v55 = vrot.slane %v1387_v53, 1  ;;  %v718_v61 = vpop.f32.mrf.mxu1  ;;  %v812_v0 = vpop.f32.mrf.mxu0  ;;  %v970_v25 = vadd.f32 %v954_v43, %v931_v36 }
 0x133   : > { %v1940_v2 = vadd.f32 %v1083_v56, %v1062_v40  ;;  %v1031_v3 = vmul.f32 %v1837_v22, %v1024_v57  ;;  %v1065_v17 = vadd.f32 %v1044_v54, %v712_v44  ;;  %v1078_v33 = vrot.slane %v812_v0, 1 }
 0x134   : > { %v1086_v18 = vmul.f32 %v1841_v28, %v1079_v55  ;;  %v722_v5 = vpop.f32.mrf.mxu1  ;;  %v1390_v49 = vpop.f32.mrf.mxu0  ;;  %v1135_v9 = vmul.f32 %v1937_v58, %v1937_v58  ;;  %v1010_v14 = vadd.f32 %v994_v60, %v970_v25 }
 0x135   : > { %v1118_v19 = vadd.f32 %v1940_v2, %v1933_v52  ;;  %v1134_v6 = vmul.f32 %v1940_v2, %v1940_v2  ;;  %v1045_v63 = vadd.f32 %v1031_v3, %v1008_v13  ;;  %v1025_v48 = vrot.slane %v722_v5, 7 }
 0x136   : > { %v1085_v10 = vmul.f32 %v1841_v28, %v1078_v33  ;;  %v822_v12 = vpop.f32.mrf.mxu0  ;;  %v1081_v34 = vrot.slane %v1390_v49, 1  ;;  %v1956_v4 = vadd.f32 %v1086_v18, %v1065_v17  ;;  %v724_v42 = vpop.f32.mrf.mxu1  ;;  %v1140_v57 = vmul.f32 %v1010_v14, %v1010_v14 }
 0x137   : > { %v1141_v29 = vadd.f32 %v1134_v6, %v1133_v24  ;;  %v1032_v30 = vmul.f32 %v1837_v22, %v1025_v48  ;;  %v1080_v35 = vrot.slane %v822_v12, 1  ;;  %v1119_v7 = vadd.f32 %v1118_v19, %v1937_v58 }
 0x138   : > { %v1958_v37 = vadd.f32 %v1085_v10, %v1064_v23  ;;  %v1066_v38 = vadd.f32 %v1045_v63, %v718_v61  ;;  %v1088_v44 = vmul.f32 %v1841_v28, %v1081_v34  ;;  %v1137_v15 = vmul.f32 %v1956_v4, %v1956_v4  ;;  %v1164_v10 = vld [vmem:[%s2041_s2] sm:$0x1] }
 0x139   : > { %v1046_v39 = vadd.f32 %v1032_v30, %v1009_v27  ;;  %v1087_v8 = vmul.f32 %v1841_v28, %v1080_v35  ;;  %v1142_v41 = vadd.f32 %v1141_v29, %v1135_v9  ;;  %v1172_v27 = vsub.s32 0, %v1820_v11  ;;  %v1166_v30 = vld [vmem:[%s2042_s3] sm:$0x1] }
 0x13a   : > { %v1136_v1 = vmul.f32 %v1958_v37, %v1958_v37  ;;  %v1120_v31 = vadd.f32 %v1119_v7, %v1958_v37 }
 0x13b   : > { %v1067_v47 = vadd.f32 %v1046_v39, %v724_v42  ;;  %v1101_v45 = vadd.f32 %v1087_v8, %v1066_v38 }
 0x13c   : > { %v1121_v32 = vadd.f32 %v1120_v31, %v1956_v4  ;;  %v1143_v46 = vadd.f32 %v1142_v41, %v1136_v1 }
 0x13d   : > { %v1102_v22 = vadd.f32 %v1088_v44, %v1067_v47  ;;  %v1138_v26 = vmul.f32 %v1101_v45, %v1101_v45 }
 0x13e   : > { %v1122_v21 = vadd.f32 %v1121_v32, %v1101_v45  ;;  %v1144_v50 = vadd.f32 %v1143_v46, %v1137_v15 }
 0x13f   : > { %v1139_v51 = vmul.f32 %v1102_v22, %v1102_v22 }
 0x140   : > { %v1123_v53 = vadd.f32 %v1122_v21, %v1102_v22  ;;  %v1145_v40 = vadd.f32 %v1144_v50, %v1138_v26 }
 0x142   : > { %v1124_v54 = vadd.f32 %v1123_v53, %v1010_v14  ;;  %v1146_v56 = vadd.f32 %v1145_v40, %v1139_v51 }
 0x144   : > { %1125 = vadd.xlane.f32.xlu0 %v1124_v54  ;;  %v1147_v16 = vadd.f32 %v1146_v56, %v1140_v57 }
 0x148   : > { %1148 = vadd.xlane.f32.xlu0 %v1147_v16 }
 0x1cd   : > { %v1126_v55 = vpop.xlane.xlu0 %1125 }
 0x1ce   : > { %v1127_v61 = vrot.slane %v1126_v55, 4 }
 0x1d0   : > { %v1128_v0 = vadd.f32 %v1127_v61, %v1126_v55 }
 0x1d1   : > { %v1149_v62 = vpop.xlane.xlu0 %1148 }
 0x1d2   : > { %v1129_v20 = vrot.slane %v1128_v0, 2  ;;  %v1150_v3 = vrot.slane %v1149_v62, 4 }
 0x1d4   : > { %v1130_v13 = vadd.f32 %v1129_v20, %v1128_v0  ;;  %v1151_v28 = vadd.f32 %v1150_v3, %v1149_v62 }
 0x1d6   : > { %v1131_v24 = vrot.slane %v1130_v13, 1  ;;  %v1152_v17 = vrot.slane %v1151_v28, 2 }
 0x1d8   : > { %v1132_v18 = vadd.f32 %v1131_v24, %v1130_v13  ;;  %v1153_v33 = vadd.f32 %v1152_v17, %v1151_v28 }
 0x1da   : > { %v1157_v5 = vmul.f32 0.00048828125, %v1132_v18  ;;  %v1154_v49 = vrot.slane %v1153_v33, 1 }
 0x1dc   : > { %v1155_v19 = vadd.f32 %v1154_v49, %v1153_v33  ;;  %v1159_v6 = vmul.f32 %v1157_v5, %v1157_v5 }
 0x1de   : > { %v1158_v63 = vmul.f32 0.00048828125, %v1155_v19 }
 0x1e0   : > { %v1160_v48 = vsub.f32 %v1158_v63, %v1159_v6 }
 0x1e2   : > { %v1161_v23 = vmax.f32 %v1160_v48, 0.0 }
 0x1e4   : > { %v1162_v9 = vadd.f32 1e-05, %v1161_v23 }
 0x1e6   : > { %1454 = vrsqrt.f32 %v1162_v9 }
 0x1f3   : > { %v1455_v12 = vpop.eup %1454 }
 0x1f4   : > { %v1165_v29 = vmul.f32 %v1455_v12, %v1164_v10 }
 0x1f6   : > { %v1167_v34 = vmul.f32 %v1165_v29, %v1157_v5  ;;  %v1173_v35 = vrot.slane %v1165_v29, %v1172_v27 }
 0x1f8   : > { %v1168_v36 = vsub.f32 %v1166_v30, %v1167_v34  ;;  %v1175_v7 = vmul.f32 %v1173_v35, %v1933_v52  ;;  %v1176_v39 = vmul.f32 %v1173_v35, %v1940_v2  ;;  %v1177_v11 = vmul.f32 %v1173_v35, %v1937_v58 }
 0x1f9   : > { %v1178_v8 = vmul.f32 %v1173_v35, %v1958_v37  ;;  %v1179_v41 = vmul.f32 %v1173_v35, %v1956_v4  ;;  %v1180_v43 = vmul.f32 %v1173_v35, %v1101_v45  ;;  %v1181_v59 = vmul.f32 %v1173_v35, %v1102_v22 }
 0x1fa   : > { %v1187_v38 = vrot.slane %v1168_v36, %v1172_v27  ;;  %v1182_v1 = vmul.f32 %v1173_v35, %v1010_v14 }
 0x1fc   : > { %v1189_v42 = vadd.f32 %v1187_v38, %v1175_v7  ;;  %v1190_v31 = vadd.f32 %v1187_v38, %v1176_v39  ;;  %v1191_v44 = vadd.f32 %v1187_v38, %v1177_v11  ;;  %v1192_v47 = vadd.f32 %v1187_v38, %v1178_v8 }
 0x1fd   : > { %v1193_v52 = vadd.f32 %v1187_v38, %v1179_v41  ;;  %v1194_v15 = vadd.f32 %v1187_v38, %v1180_v43  ;;  %v1195_v25 = vadd.f32 %v1187_v38, %v1181_v59  ;;  %v1196_v2 = vadd.f32 %v1187_v38, %v1182_v1 }
 0x1fe   : > { %v1197_v32 = vmax.f32 %v1189_v42, 0.0  ;;  %v1198_v58 = vmax.f32 %v1190_v31, 0.0  ;;  %v1199_v46 = vmax.f32 %v1191_v44, 0.0  ;;  %v1200_v37 = vmax.f32 %v1192_v47, 0.0 }
 0x1ff   : > { %v1201_v4 = vmax.f32 %v1193_v52, 0.0  ;;  %v1202_v45 = vmax.f32 %v1194_v15, 0.0  ;;  %v1203_v22 = vmax.f32 %v1195_v25, 0.0  ;;  %v1204_v26 = vmax.f32 %v1196_v2, 0.0 }
 0x200   : > { %1205 = vst [vmem:[%s205_s30] sm:$0xff] %v1197_v32  ;;  %1206 = vst [vmem:[%s205_s30 + $0x8] sm:$0xff] %v1198_v58 }
 0x201   : > { %1207 = vst [vmem:[%s205_s30 + $0x10] sm:$0xff] %v1199_v46  ;;  %1208 = vst [vmem:[%s205_s30 + $0x18] sm:$0xff] %v1200_v37 }
 0x202   : > { %1209 = vst [vmem:[%s205_s30 + $0x20] sm:$0xff] %v1201_v4  ;;  %1210 = vst [vmem:[%s205_s30 + $0x28] sm:$0xff] %v1202_v45 }
 0x203   : > { %1211 = vst [vmem:[%s205_s30 + $0x30] sm:$0xff] %v1203_v22  ;;  %1212 = vst [vmem:[%s205_s30 + $0x38] sm:$0xff] %v1204_v26 }
 0x204   : > { %1495 = shalt.err (!%p1492_p0)
}
 0x205   : > { %s1496_s13 = scalar_lea.hbm %s1993_s8, 1024  ;;  %s1500_s22 = scalar_lea.hbm %s2043_s4, 2048 }
 0x206   : > { %p1497_p1 = scmp.ne.s32.totalorder %s1993_s8, %s1496_s13  ;;  %p1501_p4 = scmp.lt.s32.totalorder %s1993_s8, %s2043_s4 }
 0x207   : > { %p1502_p7 = scmp.lt.s32.totalorder %s1500_s22, %s1496_s13 }
 0x208   : > { %p1498_p2 = pnand %p1497_p1, %p1618_p5 }
 0x209   : > { %p1503_p8 = por %p1502_p7, %p1501_p4 }
 0x20a   : > { %p1499_p3 = pneg %p1498_p2 }
 0x20c   : > { %p1504_p6 = pnand %p1503_p8, %p1499_p3 }
 0x20e   : > { %1507 = shalt.err (!%p1504_p6)
}
 0x20f   : > { %s1553_s28 = smov 128   ;;  %s1554_s29 = smov 8  }
 0x210   : > { %1403 = dma.vmem_to_hbm [thread:$0]  (%p1618_p5), %s1995_s5, 1024, %s1993_s8, %s1999_s19, %s1553_s28, %s1553_s28, %s1554_s29  }
 0x211 PF: > { %p1415_p9 = scmp.ge.s32.totalorder %s1546_s18, 2  ;;  %s1242_s30 = sand.u32 1, %s1534_s15  }
 0x212   : > { %p2047_p10 = scmp.ne.s32.totalorder %s2045_s26, 0  ;;  %s1243_s6 = scalar_lea.sflag [#allocation5], %s1242_s30 }
 0x214   : > { %p1410_p11 = pnand %p1415_p9, %p2047_p10 }
 0x216   : > { %p1411_p12 = pneg %p1410_p11 }
 0x218   : > { %1529 = dma.done.wait (%p1411_p12), %s1243_s6, 1024  }
 0x219   : > { %1531 = vsyncadd (%p1411_p12), %s1243_s6, 4294966272  ;;  %p15_p13 = scmp.ge.s32.totalorder %s1605_s21, 4   ;;  %s2048_s15 = smov %s1538_s16 }
 0x21a   : > { %s2049_s16 = smov %s1542_s17  ;;  %s2050_s17 = smov %s1616_s24 }
 0x21b   : > { %s2051_s18 = smov %s1605_s21  ;;  %17 = sbr.rel (!%p15_p13) target bundleno = 4 (0x4), region = 77 }
 0x220   :  { %1248 = vsyncpa [#allocation4], 1 }
 0x221   :  { %1250 = vsyncpa [#allocation4 + $0x1], 1 }
 0x222   :  { %1251 = vsyncpa [#allocation5], 1 }
 0x223   :  { %1253 = vsyncpa [#allocation5 + $0x1], 1 }

// kernel: tpu_custom_call.1
= control target key start
LH: loop header
LB: loop body
LE: loop exit
PB: predicated region body
PF: predicated region fallthrough
CT: control target
= control target key end

     0   :  { %9 = vsyncpa [#allocation4], 0  ;;  %s2039_s0 = inlined_call_operand.vmem [shape: f32[2,64,32], index: 0, kind: input, shape index: {}]   ;;  %s2040_s1 = inlined_call_operand.hbm [shape: f32[32,1152], index: 1, kind: input, shape index: {}]   ;;  %s2041_s2 = inlined_call_operand.vmem [shape: f32[1,128], index: 2, kind: input, shape index: {}]   ;;  %s2042_s3 = inlined_call_operand.vmem [shape: f32[1,128], index: 3, kind: input, shape index: {}]   ;;  %s2043_s4 = inlined_call_operand.hbm [shape: f32[2,8,8,128], index: 4, kind: output, shape index: {}]  }
   0x1   :  { %10 = vsyncpa [#allocation5], 0 }
   0x2   :  { %12 = vsyncpa [#allocation5 + $0x1], 0  ;;  %s1580_s15 = smov 0   ;;  %s1582_s16 = smov 0  }
   0x3   :  { %s1584_s17 = smov 0   ;;  %s1586_s18 = smov 0  }
   0x4 LB: > { %s1601_s19 = sadd.s32 4294967295, %s1546_s18   ;;  %s1301_s20 = sadd.s32 4294967294, %s1546_s18   ;;  %s1546_s18 = sphi %s1586_s18, %s2051_s18   ;;  %s1542_s17 = sphi %s1584_s17, %s2050_s17   ;;  %s1538_s16 = sphi %s1582_s16, %s2049_s16   ;;  %s1534_s15 = sphi %s1580_s15, %s2048_s15  }
   0x5   : > { %s1605_s21 = sadd.s32 1, %s1546_s18   ;;  %s114_s22 = sadd.s32 1, %s1542_s17 }
   0x6   : > { %s111_s23 = ssub.s32 %s1546_s18, %s1605_s21  ;;  %p124_p0 = scmp.ne.s32.totalorder %s1542_s17, %s1538_s16 }
   0x7   : > { %p112_p1 = scmp.eq.s32.totalorder %s111_s23, 0  ;;  %p125_p2 = scmp.eq.s32.totalorder %s1601_s19, 1 }
   0x8   : > { %p130_p3 = scmp.ne.s32.totalorder %s1538_s16, %s1534_s15  ;;  %p131_p4 = scmp.eq.s32.totalorder %s1301_s20, 1 }
   0x9   : > { %s1616_s24 = scalar_select %p112_p1, %s1542_s17, %s114_s22  }
   0xa   : > { %p1618_p5 = por %p125_p2, %p124_p0  ;;  %p1622_p6 = por %p131_p4, %p130_p3 }
   0xb   : > { %p1302_p7 = scmp.ge.s32.totalorder %s1546_s18, 1  ;;  %p138_p8 = scmp.lt.s32.totalorder %s1546_s18, 3 }
   0xc   : > { %s2045_s26 = scalar_select %p1622_p6, 1, 0 }
   0xd   : > { %p1413_p9 = scmp.eq.s32.totalorder %s1601_s19, 0  ;;  %p1629_p10 = pnand %p1302_p7, %p138_p8 }
   0xe   : > { %s1548_s28 = smov [#allocation3]  }
   0xf   : > { %s150_s29 = sshll.u32 %s1548_s28, 4  ;;  %p1405_p11 = pneg %p1629_p10  ;;  %s151_s29 = int_to_ptr.vmem [resolvable:$true] %s150_s29 }
  0x10   : > { %s1467_s30 = scalar_lea.vmem %s151_s29, 4608  ;;  %p1475_p3 = scmp.lt.s32.totalorder %s151_s29, %s151_s29 }
  0x11   : > { %p1406_p12 = pnand %p1413_p9, %p1405_p11  ;;  %p1468_p0 = scmp.ne.s32.totalorder %s151_s29, %s1467_s30 }
  0x12   : > { %p1476_p4 = scmp.lt.s32.totalorder %s1467_s30, %s1467_s30 }
  0x13   : > { %p1458_p13 = pneg %p1406_p12 }
  0x14   : > { %p1477_p6 = por %p1476_p4, %p1475_p3 }
  0x15   : > { %p1470_p1 = pnand %p1468_p0, %p1458_p13 }
  0x17   : > { %p1471_p2 = pneg %p1470_p1 }
  0x19   : > { %p1478_p7 = pnand %p1477_p6, %p1471_p2 }
  0x1b   : > { %1481 = shalt.err (!%p1478_p7)
}
  0x1c   : > { %s1549_s5 = smov 1152   ;;  %s1550_s6 = smov 72  }
  0x1d   : > { %1408 = dma.hbm_to_vmem [thread:$0]  (!%p1406_p12), %s2040_s1, 4608, %s151_s29, [#allocation4], %s1549_s5, %s1549_s5, %s1550_s6  }
  0x1e   : > { %180 = sbr.rel (%p1629_p10) target bundleno = 529 (0x211), region = 36 }
  0x23   : > { %1525 = dma.done.wait (%p1413_p9), [#allocation4], 4608  }
  0x24   : > { %1527 = vsyncadd (%p1413_p9), [#allocation4], 4294962688  ;;  %p206_p8 = scmp.lt.s32.totalorder %s1601_s19, 1  ;;  %v1551_v0 = vmov 0.0   ;;  %v247_v1 = vld [vmem:[#allocation3 + $0xe0] sm:$0xff]  ;;  %v246_v2 = vld [vmem:[#allocation3 + $0xd8] sm:$0xff] }
  0x25   : > { %344 = vmatprep.mubr.f32.mxu0 %v1551_v0  ;;  %380 = vmatprep.mubr.f32.mxu1 %v1551_v0  ;;  %v238_v3 = vld [vmem:[#allocation3 + $0x98] sm:$0xff]  ;;  %v237_v4 = vld [vmem:[#allocation3 + $0x90] sm:$0xff]  ;;  %v228_v6 = vld [vmem:[#allocation3 + $0x48] sm:$0xff]  ;;  %vm255_vm0 = vcmask 261120   ;;  %s203_s22 = sand.u32 1, %s1538_s16   ;;  %s1358_s29 = sshll.u32 %s1601_s19, 10 }
  0x26   : > { %s207_s9 = scalar_select %p206_p8, %s1601_s19, 1  ;;  %304 = vmatprep.subr.mxu0 %v247_v1  ;;  %1391 = vmatprep.subr.mxu1 %v247_v1  ;;  %v229_v5 = vld [vmem:[#allocation3 + $0x50] sm:$0xff]  ;;  %v220_v7 = vld [vmem:[#allocation3 + $0x8] sm:$0xff]  ;;  %v219_v8 = vld [vmem:[#allocation3] sm:$0xff] }
  0x27   : > { %305 = vmatpush1.msra.mxu0 %v246_v2  ;;  %1395 = vmatpush1.msra.mxu1 %v246_v2  ;;  %v249_v11 = vld [vmem:[#allocation3 + $0xf0] sm:$0xff]  ;;  %v251_v12 = vld [vmem:[#allocation3 + $0x100] sm:$0xff]  ;;  %v248_v13 = vld [vmem:[#allocation3 + $0xe8] sm:$0xff]  ;;  %s1307_s28 = sshll.u32 %s203_s22, 6  ;;  %s1993_s8 = scalar_lea.hbm %s2043_s4, %s1358_s29 }
  0x28   : > { %s1357_s10 = sshll.u32 %s207_s9, 6  ;;  %306 = vmatprep.subr.mxu0 %v238_v3  ;;  %1392 = vmatprep.subr.mxu1 %v238_v3  ;;  %v250_v14 = vld [vmem:[#allocation3 + $0xf8] sm:$0xff]  ;;  %v240_v15 = vld [vmem:[#allocation3 + $0xa8] sm:$0xff]  ;;  %v239_v16 = vld [vmem:[#allocation3 + $0xa0] sm:$0xff]  ;;  %s205_s30 = scalar_lea.vmem [#allocation6], %s1307_s28 }
  0x29   : > { %s1653_s13 = scalar_lea.vmem %s2039_s0, %s1357_s10  ;;  %307 = vmatpush1.msra.mxu0 %v237_v4  ;;  %1396 = vmatpush1.msra.mxu1 %v237_v4  ;;  %v231_v19 = vld [vmem:[#allocation3 + $0x60] sm:$0xff]  ;;  %v242_v20 = vld [vmem:[#allocation3 + $0xb8] sm:$0xff]  ;;  %v221_v23 = vld [vmem:[#allocation3 + $0x10] sm:$0xff]  ;;  %s1227_s5 = sshll.u32 %s205_s30, 4  ;;  %s1995_s5 = int_to_ptr.vmem [resolvable:$true] %s1227_s5 }
  0x2a   : > { %308 = vmatprep.subr.mxu0 %v229_v5  ;;  %1393 = vmatprep.subr.mxu1 %v229_v5  ;;  %v1656_v9 = vld [vmem:[%s1653_s13] sm:$0xff]  ;;  %v1659_v10 = vld [vmem:[%s1653_s13 + $0x30] sm:$0xff]  ;;  %v1666_v17 = vld [vmem:[%s1653_s13 + $0x8] sm:$0xff]  ;;  %s1999_s19 = scalar_lea.sflag [#allocation5], %s203_s22  ;;  %s1482_s9 = scalar_lea.vmem %s1995_s5, 1024 }
  0x2b   : > { %309 = vmatpush1.msra.mxu0 %v228_v6  ;;  %1397 = vmatpush1.msra.mxu1 %v228_v6  ;;  %v1669_v18 = vld [vmem:[%s1653_s13 + $0x38] sm:$0xff]  ;;  %v241_v24 = vld [vmem:[#allocation3 + $0xb0] sm:$0xff]  ;;  %v252_v27 = vld [vmem:[#allocation3 + $0x108] sm:$0xff]  ;;  %v831_v6 = vlaneseq  ;;  %p1483_p6 = scmp.ne.s32.totalorder %s1995_s5, %s1482_s9  ;;  %s1552_s10 = smov [#allocation6]  }
  0x2c   : > { %310 = vmatprep.subr.mxu0 %v220_v7  ;;  %1394 = vmatprep.subr.mxu1 %v220_v7  ;;  %v230_v21 = vld [vmem:[#allocation3 + $0x58] sm:$0xff]  ;;  %v1679_v25 = vld [vmem:[%s1653_s13 + $0x10] sm:$0xff]  ;;  %v244_v29 = vld [vmem:[#allocation3 + $0xc8] sm:$0xff]  ;;  %s1486_s11 = sshll.u32 %s1552_s10, 4  ;;  %s1487_s11 = int_to_ptr.vmem [resolvable:$false] %s1486_s11 }
  0x2d   : > { %311 = vmatpush1.msra.mxu0 %v219_v8  ;;  %1398 = vmatpush1.msra.mxu1 %v219_v8  ;;  %v222_v22 = vld [vmem:[#allocation3 + $0x18] sm:$0xff]  ;;  %v253_v26 = vld [vmem:[#allocation3 + $0x110] sm:$0xff]  ;;  %v232_v31 = vld [vmem:[#allocation3 + $0x68] sm:$0xff]  ;;  %p1484_p9 = pnand %p1483_p6, %p1618_p5  ;;  %s1488_s12 = scalar_lea.vmem %s1487_s11, 2048 }
  0x2e   : > { %1310 = vmatmul.mubr.msk.f32.vlgmr.msra.gmra.mxu0 %vm255_vm0, %v1656_v9  ;;  %1316 = vmatmul.mubr.msk.f32.vlgmr.msra.gmra.mxu1 %vm255_vm0, %v1659_v10  ;;  %v233_v28 = vld [vmem:[#allocation3 + $0x70] sm:$0xff]  ;;  %v1688_v30 = vld [vmem:[%s1653_s13 + $0x18] sm:$0xff]  ;;  %v243_v32 = vld [vmem:[#allocation3 + $0xc0] sm:$0xff]  ;;  %p1489_p11 = scmp.lt.s32.totalorder %s1995_s5, %s1487_s11  ;;  %p1490_p12 = scmp.lt.s32.totalorder %s1488_s12, %s1482_s9 }
  0x2f   : > { %415 = vmatprep.subr.mxu1 %v249_v11  ;;  %527 = vmatprep.subr.mxu0 %v251_v12  ;;  %v224_v33 = vld [vmem:[#allocation3 + $0x28] sm:$0xff]  ;;  %v235_v34 = vld [vmem:[#allocation3 + $0x80] sm:$0xff]  ;;  %v234_v37 = vld [vmem:[#allocation3 + $0x78] sm:$0xff]  ;;  %v1820_v11 = vshrl.u32 %v831_v6, 7  ;;  %p1485_p10 = pneg %p1484_p9 }
  0x30   : > { %416 = vmatpush1.msra.mxu1 %v248_v13  ;;  %528 = vmatpush1.msra.mxu0 %v250_v14  ;;  %v1697_v35 = vld [vmem:[%s1653_s13 + $0x20] sm:$0xff]  ;;  %v254_v38 = vld [vmem:[#allocation3 + $0x118] sm:$0xff]  ;;  %v216_v40 = vld [vmem:[%s1653_s13 + $0x28] sm:$0xff]  ;;  %p1491_p13 = por %p1490_p12, %p1489_p11 }
  0x31   : > { %417 = vmatprep.subr.mxu1 %v240_v15  ;;  %350 = vmatprep.mubr.f32.mxu0 %v1551_v0  ;;  %v223_v36 = vld [vmem:[#allocation3 + $0x20] sm:$0xff]  ;;  %v226_v39 = vld [vmem:[#allocation3 + $0x38] sm:$0xff]  ;;  %v225_v41 = vld [vmem:[#allocation3 + $0x30] sm:$0xff]  ;;  %vm833_vm1 = vcmp.gt.s32.totalorder %v1820_v11, 0  ;;  %vm836_vm2 = vcmp.lt.s32.totalorder %v1820_v11, 7 }
  0x32   : > { %386 = vmatprep.mubr.f32.mxu1 %v1551_v0  ;;  %418 = vmatpush1.msra.mxu1 %v239_v16  ;;  %v245_v42 = vld [vmem:[#allocation3 + $0xd0] sm:$0xff]  ;;  %v236_v43 = vld [vmem:[#allocation3 + $0x88] sm:$0xff]  ;;  %v227_v44 = vld [vmem:[#allocation3 + $0x40] sm:$0xff]  ;;  %p1492_p0 = pnand %p1491_p13, %p1485_p10 }
  0x33   : > { %1311 = vmatmul.mubr.msk.f32.gmra.mxu0 %vm255_vm0, %v1666_v17  ;;  %1317 = vmatmul.mubr.msk.f32.gmra.mxu1 %vm255_vm0, %v1669_v18 }
  0x34   : > { %419 = vmatprep.subr.mxu1 %v231_v19  ;;  %529 = vmatprep.subr.mxu0 %v242_v20 }
  0x35   : > { %420 = vmatpush1.msra.mxu1 %v230_v21  ;;  %356 = vmatprep.mubr.f32.mxu0 %v1551_v0 }
  0x36   : > { %421 = vmatprep.subr.mxu1 %v222_v22  ;;  %455 = vmatprep.mubr.f32.mxu1 %v1551_v0  ;;  %v1837_v22 = vsel %vm833_vm1, 1.0, %v1551_v0 }
  0x37   : > { %422 = vmatpush1.msra.mxu1 %v221_v23  ;;  %530 = vmatpush1.msra.mxu0 %v241_v24 }
  0x38   : > { %1312 = vmatmul.mubr.msk.f32.gmra.mxu0 %vm255_vm0, %v1679_v25  ;;  %1318 = vmatmul.mubr.msk.f32.vlgmr.msra.gmra.mxu1 %vm255_vm0, %v1656_v9 }
  0x39   : > { %640 = vmatprep.subr.mxu1 %v253_v26  ;;  %362 = vmatprep.mubr.f32.mxu0 %v1551_v0 }
  0x3a   : > { %641 = vmatpush1.msra.mxu1 %v252_v27  ;;  %461 = vmatprep.mubr.f32.mxu1 %v1551_v0 }
  0x3b   : > { %531 = vmatprep.subr.mxu0 %v233_v28  ;;  %642 = vmatprep.subr.mxu1 %v244_v29  ;;  %v1841_v28 = vsel %vm836_vm2, 1.0, %v1551_v0 }
  0x3c   : > { %1313 = vmatmul.mubr.msk.f32.gmra.mxu0 %vm255_vm0, %v1688_v30  ;;  %1319 = vmatmul.mubr.msk.f32.gmra.mxu1 %vm255_vm0, %v1666_v17 }
  0x3d   : > { %532 = vmatpush1.msra.mxu0 %v232_v31  ;;  %368 = vmatprep.mubr.f32.mxu0 %v1551_v0 }
  0x3e   : > { %467 = vmatprep.mubr.f32.mxu1 %v1551_v0  ;;  %643 = vmatpush1.msra.mxu1 %v243_v32 }
  0x3f   : > { %533 = vmatprep.subr.mxu0 %v224_v33  ;;  %644 = vmatprep.subr.mxu1 %v235_v34 }
  0x40   : > { %1314 = vmatmul.mubr.msk.f32.gmra.mxu0 %vm255_vm0, %v1697_v35  ;;  %1320 = vmatmul.mubr.msk.f32.gmra.mxu1 %vm255_vm0, %v1679_v25 }
  0x41   : > { %374 = vmatprep.mubr.f32.mxu0 %v1551_v0  ;;  %473 = vmatprep.mubr.f32.mxu1 %v1551_v0 }
  0x42   : > { %534 = vmatpush1.msra.mxu0 %v223_v36  ;;  %645 = vmatpush1.msra.mxu1 %v234_v37 }
  0x43   : > { %1371 = vmatprep.subr.mxu0 %v254_v38  ;;  %646 = vmatprep.subr.mxu1 %v226_v39 }
  0x44   : > { %1315 = vmatmul.mubr.msk.f32.gmra.mxu0 %vm255_vm0, %v216_v40  ;;  %1321 = vmatmul.mubr.msk.f32.gmra.mxu1 %vm255_vm0, %v1688_v30 }
  0x45   : > { %479 = vmatprep.mubr.f32.mxu1 %v1551_v0  ;;  %567 = vmatprep.mubr.f32.mxu0 %v1551_v0 }
  0x46   : > { %647 = vmatpush1.msra.mxu1 %v225_v41 }
  0x48   : > { %1322 = vmatmul.mubr.msk.f32.gmra.mxu1 %vm255_vm0, %v1697_v35  ;;  %1326 = vmatmul.mubr.msk.f32.vlgmr.msra.gmra.mxu0 %vm255_vm0, %v1656_v9 }
  0x49   : > { %1372 = vmatpush3.msra.mxu0 %v254_v38  ;;  %485 = vmatprep.mubr.f32.mxu1 %v1551_v0 }
  0x4a   : > { %573 = vmatprep.mubr.f32.mxu0 %v1551_v0  ;;  %1373 = vmatprep.subr.mxu0 %v245_v42 }
  0x4b   : > { %1374 = vmatpush3.msra.mxu0 %v245_v42 }
  0x4c   : > { %1323 = vmatmul.mubr.msk.f32.gmra.mxu1 %vm255_vm0, %v216_v40  ;;  %1327 = vmatmul.mubr.msk.f32.gmra.mxu0 %vm255_vm0, %v1666_v17 }
  0x4d   : > { %491 = vmatprep.mubr.f32.mxu1 %v1551_v0  ;;  %579 = vmatprep.mubr.f32.mxu0 %v1551_v0 }
  0x4e   : > { %1375 = vmatprep.subr.mxu0 %v236_v43 }
  0x4f   : > { %1376 = vmatpush3.msra.mxu0 %v236_v43 }
  0x50   : > { %1324 = vmatmul.mubr.msk.f32.gmra.mxu1 %vm255_vm0, %v1659_v10  ;;  %1328 = vmatmul.mubr.msk.f32.gmra.mxu0 %vm255_vm0, %v1679_v25 }
  0x51   : > { %497 = vmatprep.mubr.f32.mxu1 %v1551_v0  ;;  %585 = vmatprep.mubr.f32.mxu0 %v1551_v0 }
  0x52   : > { %1377 = vmatprep.subr.mxu0 %v227_v44 }
  0x53   : > { %1378 = vmatpush3.msra.mxu0 %v227_v44 }
  0x54   : > { %1325 = vmatmul.mubr.msk.f32.gmra.mxu1 %vm255_vm0, %v1669_v18  ;;  %1329 = vmatmul.mubr.msk.f32.gmra.mxu0 %vm255_vm0, %v1688_v30 }
  0x55   : > { %591 = vmatprep.mubr.f32.mxu0 %v1551_v0  ;;  %680 = vmatprep.mubr.f32.mxu1 %v1551_v0 }
  0x58   : > { %1330 = vmatmul.mubr.msk.f32.gmra.mxu0 %vm255_vm0, %v1697_v35  ;;  %1334 = vmatmul.mubr.msk.f32.vlgmr.msra.gmra.mxu1 %vm255_vm0, %v1656_v9 }
  0x59   : > { %597 = vmatprep.mubr.f32.mxu0 %v1551_v0  ;;  %684 = vmatprep.mubr.f32.mxu1 %v1551_v0 }
  0x5c   : > { %1331 = vmatmul.mubr.msk.f32.gmra.mxu0 %vm255_vm0, %v216_v40  ;;  %1335 = vmatmul.mubr.msk.f32.gmra.mxu1 %vm255_vm0, %v1666_v17 }
  0x5d   : > { %603 = vmatprep.mubr.f32.mxu0 %v1551_v0  ;;  %690 = vmatprep.mubr.f32.mxu1 %v1551_v0 }
  0x60   : > { %1332 = vmatmul.mubr.msk.f32.gmra.mxu0 %vm255_vm0, %v1659_v10  ;;  %1336 = vmatmul.mubr.msk.f32.gmra.mxu1 %vm255_vm0, %v1679_v25 }
  0x61   : > { %609 = vmatprep.mubr.f32.mxu0 %v1551_v0  ;;  %696 = vmatprep.mubr.f32.mxu1 %v1551_v0 }
  0x64   : > { %1333 = vmatmul.mubr.msk.f32.gmra.mxu0 %vm255_vm0, %v1669_v18  ;;  %1337 = vmatmul.mubr.msk.f32.gmra.mxu1 %vm255_vm0, %v1688_v30 }
  0x65   : > { %702 = vmatprep.mubr.f32.mxu1 %v1551_v0  ;;  %1379 = vmatprep.mubr.msk.f32.mxu0 %vm255_vm0, %v1656_v9 }
  0x68   : > { %1338 = vmatmul.mubr.msk.f32.gmra.mxu1 %vm255_vm0, %v1697_v35  ;;  %1380 = vmatmul.mubr.msk.f32.vlgmr.msra.gmra.mxu0 %vm255_vm0, %v1666_v17 }
  0x69   : > { %708 = vmatprep.mubr.f32.mxu1 %v1551_v0  ;;  %1382 = vmatprep.mubr.msk.f32.mxu0 %vm255_vm0, %v1679_v25 }
  0x6c   : > { %1339 = vmatmul.mubr.msk.f32.gmra.mxu1 %vm255_vm0, %v216_v40  ;;  %1383 = vmatmul.mubr.msk.f32.gmra.mxu0 %vm255_vm0, %v1688_v30 }
  0x6d   : > { %714 = vmatprep.mubr.f32.mxu1 %v1551_v0  ;;  %1385 = vmatprep.mubr.msk.f32.mxu0 %vm255_vm0, %v1697_v35 }
  0x70   : > { %1340 = vmatmul.mubr.msk.f32.gmra.mxu1 %vm255_vm0, %v1659_v10  ;;  %1386 = vmatmul.mubr.msk.f32.gmra.mxu0 %vm255_vm0, %v216_v40 }
  0x71   : > { %720 = vmatprep.mubr.f32.mxu1 %v1551_v0  ;;  %1388 = vmatprep.mubr.msk.f32.mxu0 %vm255_vm0, %v1659_v10 }
  0x74   : > { %1341 = vmatmul.mubr.msk.f32.gmra.mxu1 %vm255_vm0, %v1669_v18  ;;  %1389 = vmatmul.mubr.msk.f32.gmra.mxu0 %vm255_vm0, %v1669_v18 }
  0xee   : > { %v346_v45 = vpop.f32.mrf.mxu0  ;;  %v1782_v46 = vpop.f32.mrf.mxu1 }
  0xef   : > { %v847_v18 = vrot.slane %v346_v45, 7  ;;  %v853_v25 = vrot.slane %v1782_v46, 7 }
  0xf0   : > { %v1784_v47 = vpop.f32.mrf.mxu0  ;;  %v1786_v48 = vpop.f32.mrf.mxu1 }
  0xf1   : > { %v854_v30 = vmul.f32 %v1837_v22, %v847_v18  ;;  %v860_v42 = vmul.f32 %v1837_v22, %v853_v25 }
  0xf3   : > { %v352_v49 = vpop.f32.mrf.mxu0  ;;  %v388_v50 = vpop.f32.mrf.mxu1 }
  0xf4   : > { %v848_v19 = vrot.slane %v352_v49, 7 }
  0xf5   : > { %v1788_v51 = vpop.f32.mrf.mxu0  ;;  %v389_v52 = vpop.f32.mrf.mxu1 }
  0xf6   : > { %v855_v31 = vmul.f32 %v1837_v22, %v848_v19 }
  0xf8   : > { %v358_v53 = vpop.f32.mrf.mxu0  ;;  %v457_v54 = vpop.f32.mrf.mxu1 }
  0xf9   : > { %v849_v26 = vrot.slane %v358_v53, 7  ;;  %v904_v27 = vrot.slane %v457_v54, 1 }
  0xfa   : > { %v1790_v55 = vpop.f32.mrf.mxu0  ;;  %v459_v56 = vpop.f32.mrf.mxu1 }
  0xfb   : > { %v939_v29 = vrot.slane %v459_v56, 7  ;;  %v911_v40 = vmul.f32 %v1841_v28, %v904_v27  ;;  %v856_v41 = vmul.f32 %v1837_v22, %v849_v26 }
  0xfc   : > { %v364_v57 = vpop.f32.mrf.mxu0  ;;  %v463_v58 = vpop.f32.mrf.mxu1 }
  0xfd   : > { %v850_v34 = vrot.slane %v364_v57, 7  ;;  %v905_v35 = vrot.slane %v463_v58, 1  ;;  %v947_v46 = vmul.f32 %v1837_v22, %v939_v29 }
  0xfe   : > { %v1792_v59 = vpop.f32.mrf.mxu0  ;;  %v1794_v60 = vpop.f32.mrf.mxu1 }
  0xff   : > { %v940_v0 = vrot.slane %v1794_v60, 7  ;;  %v857_v56 = vmul.f32 %v1837_v22, %v850_v34  ;;  %v912_v57 = vmul.f32 %v1841_v28, %v905_v35 }
 0x100   : > { %v1796_v61 = vpop.f32.mrf.mxu0  ;;  %v1798_v62 = vpop.f32.mrf.mxu1 }
 0x101   : > { %v851_v43 = vrot.slane %v1796_v61, 7  ;;  %v906_v44 = vrot.slane %v1798_v62, 1  ;;  %v948_v6 = vmul.f32 %v1837_v22, %v940_v0 }
 0x102   : > { %v1800_v63 = vpop.f32.mrf.mxu0  ;;  %v1802_v1 = vpop.f32.mrf.mxu1 }
 0x103   : > { %v941_v45 = vrot.slane %v1802_v1, 7 }
 0x104   : > { %v1804_v2 = vpop.f32.mrf.mxu0  ;;  %v1806_v3 = vpop.f32.mrf.mxu1 }
 0x105   : > { %v852_v52 = vrot.slane %v1804_v2, 7  ;;  %v907_v53 = vrot.slane %v1806_v3, 1 }
 0x106   : > { %v1808_v4 = vpop.f32.mrf.mxu0  ;;  %v1810_v5 = vpop.f32.mrf.mxu1 }
 0x107   : > { %v942_v58 = vrot.slane %v1810_v5, 7  ;;  %v858_v5 = vmul.f32 %v1837_v22, %v851_v43  ;;  %v914_v19 = vmul.f32 %v1841_v28, %v907_v53 }
 0x108   : > { %v1812_v7 = vpop.f32.mrf.mxu1  ;;  %v1814_v8 = vpop.f32.mrf.mxu0 }
 0x109   : > { %v908_v2 = vrot.slane %v1812_v7, 1  ;;  %v1883_v25 = vmul.f32 %v1837_v22, %v942_v58  ;;  %v963_v34 = vadd.f32 %v947_v46, %v1814_v8 }
 0x10a   : > { %v1816_v9 = vpop.f32.mrf.mxu1  ;;  %v1818_v10 = vpop.f32.mrf.mxu0 }
 0x10b   : > { %v979_v54 = vrot.slane %v1818_v10, 1  ;;  %v943_v3 = vrot.slane %v1816_v9, 7  ;;  %v913_v10 = vmul.f32 %v1841_v28, %v906_v44  ;;  %v859_v9 = vmul.f32 %v1837_v22, %v852_v52 }
 0x10c   : > { %v1822_v12 = vpop.f32.mrf.mxu1  ;;  %v575_v13 = vpop.f32.mrf.mxu0 }
 0x10d   : > { %v869_v36 = vadd.f32 %v854_v30, %v575_v13  ;;  %v909_v18 = vrot.slane %v1822_v12, 1  ;;  %v951_v35 = vmul.f32 %v1837_v22, %v943_v3 }
 0x10e   : > { %v1824_v14 = vpop.f32.mrf.mxu1  ;;  %v1826_v15 = vpop.f32.mrf.mxu0 }
 0x10f   : > { %v890_v60 = vadd.f32 %v869_v36, %v1784_v47  ;;  %v944_v7 = vrot.slane %v1824_v14, 7  ;;  %v916_v14 = vmul.f32 %v1841_v28, %v909_v18 }
 0x110   : > { %v1829_v16 = vpop.f32.mrf.mxu1  ;;  %v581_v17 = vpop.f32.mrf.mxu0 }
 0x111   : > { %v870_v37 = vadd.f32 %v855_v31, %v581_v17  ;;  %v949_v17 = vmul.f32 %v1837_v22, %v941_v45  ;;  %v925_v26 = vadd.f32 %v911_v40, %v890_v60  ;;  %v915_v31 = vmul.f32 %v1841_v28, %v908_v2 }
 0x112   : > { %v1831_v20 = vpop.f32.mrf.mxu1  ;;  %v1833_v21 = vpop.f32.mrf.mxu0  ;;  %v1897_v0 = vmul.f32 %v1837_v22, %v944_v7  ;;  %v910_v8 = vrot.slane %v1829_v16, 1 }
 0x113   : > { %v891_v61 = vadd.f32 %v870_v37, %v1788_v51  ;;  %v980_v37 = vrot.slane %v1826_v15, 1  ;;  %v964_v45 = vadd.f32 %v948_v6, %v925_v26 }
 0x114   : > { %v499_v23 = vpop.f32.mrf.mxu1  ;;  %v587_v24 = vpop.f32.mrf.mxu0 }
 0x115   : > { %v987_v23 = vmul.f32 %v1841_v28, %v979_v54  ;;  %v926_v27 = vadd.f32 %v912_v57, %v891_v61  ;;  %v871_v12 = vadd.f32 %v856_v41, %v587_v24 }
 0x116   : > { %v1845_v32 = vpop.f32.mrf.mxu1  ;;  %v1847_v33 = vpop.f32.mrf.mxu0 }
 0x117   : > { %v1003_v43 = vadd.f32 %v987_v23, %v963_v34  ;;  %v892_v44 = vadd.f32 %v871_v12, %v1790_v55  ;;  %v982_v55 = vrot.slane %v1847_v33, 1  ;;  %v946_v26 = vrot.slane %v1845_v32, 7 }
 0x118   : > { %v593_v38 = vpop.f32.mrf.mxu0  ;;  %v682_v39 = vpop.f32.mrf.mxu1 }
 0x119   : > { %v872_v13 = vadd.f32 %v857_v56, %v593_v38  ;;  %v981_v38 = vrot.slane %v1833_v21, 1  ;;  %v965_v21 = vadd.f32 %v949_v17, %v926_v27  ;;  %v988_v56 = vmul.f32 %v1841_v28, %v980_v37 }
 0x11a   : > { %v1857_v49 = vpop.f32.mrf.mxu0  ;;  %v683_v50 = vpop.f32.mrf.mxu1  ;;  %v927_v2 = vadd.f32 %v913_v10, %v892_v44  ;;  %v990_v10 = vmul.f32 %v1841_v28, %v982_v55 }
 0x11b   : > { %v893_v36 = vadd.f32 %v872_v13, %v1792_v59  ;;  %v945_v59 = vrot.slane %v1831_v20, 7  ;;  %v989_v57 = vmul.f32 %v1841_v28, %v981_v38  ;;  %v983_v61 = vrot.slane %v1857_v49, 1 }
 0x11c   : > { %v599_v62 = vpop.f32.mrf.mxu0  ;;  %v686_v1 = vpop.f32.mrf.mxu1  ;;  %v1004_v33 = vadd.f32 %v988_v56, %v964_v45 }
 0x11d   : > { %v1019_v39 = vrot.slane %v686_v1, 7  ;;  %v873_v41 = vadd.f32 %v858_v5, %v599_v62  ;;  %v928_v50 = vadd.f32 %v914_v19, %v893_v36  ;;  %v953_v6 = vmul.f32 %v1837_v22, %v945_v59 }
 0x11e   : > { %v1874_v47 = vpop.f32.mrf.mxu0  ;;  %v1876_v51 = vpop.f32.mrf.mxu1  ;;  %v1005_v5 = vadd.f32 %v989_v57, %v965_v21  ;;  %v991_v27 = vmul.f32 %v1841_v28, %v983_v61 }
 0x11f   : > { %v1026_v16 = vmul.f32 %v1837_v22, %v1019_v39  ;;  %v894_v62 = vadd.f32 %v873_v41, %v1800_v63  ;;  %v967_v49 = vadd.f32 %v951_v35, %v928_v50  ;;  %v966_v35 = vadd.f32 %v1883_v25, %v927_v2 }
 0x120   : > { %v605_v29 = vpop.f32.mrf.mxu0  ;;  %v692_v30 = vpop.f32.mrf.mxu1 }
 0x121   : > { %v1020_v52 = vrot.slane %v692_v30, 7  ;;  %v874_v58 = vadd.f32 %v859_v9, %v605_v29  ;;  %v1040_v19 = vadd.f32 %v1026_v16, %v1003_v43  ;;  %v929_v12 = vadd.f32 %v915_v31, %v894_v62 }
 0x122   : > { %v1892_v40 = vpop.f32.mrf.mxu0  ;;  %v1894_v24 = vpop.f32.mrf.mxu1  ;;  %v984_v29 = vrot.slane %v1874_v47, 1 }
 0x123   : > { %v1027_v18 = vmul.f32 %v1837_v22, %v1020_v52  ;;  %v895_v63 = vadd.f32 %v874_v58, %v1808_v4  ;;  %v1061_v41 = vadd.f32 %v1040_v19, %v1876_v51  ;;  %v985_v59 = vrot.slane %v1892_v40, 1 }
 0x124   : > { %v611_v15 = vpop.f32.mrf.mxu0  ;;  %v698_v46 = vpop.f32.mrf.mxu1  ;;  %v992_v21 = vmul.f32 %v1841_v28, %v984_v29  ;;  %v1006_v51 = vadd.f32 %v990_v10, %v966_v35 }
 0x125   : > { %v875_v53 = vadd.f32 %v860_v42, %v611_v15  ;;  %v1021_v54 = vrot.slane %v698_v46, 7  ;;  %v1914_v42 = vmul.f32 %v1841_v28, %v910_v8  ;;  %v1041_v37 = vadd.f32 %v1027_v18, %v1004_v33 }
 0x126   : > { %v1905_v60 = vpop.f32.mrf.mxu0  ;;  %v700_v20 = vpop.f32.mrf.mxu1  ;;  %v1007_v8 = vadd.f32 %v991_v27, %v967_v49  ;;  %v930_v43 = vadd.f32 %v916_v14, %v895_v63  ;;  %v968_v46 = vadd.f32 %v1897_v0, %v929_v12 }
 0x127   : > { %v1911_v1 = vadd.f32 %v875_v53, %v1786_v48  ;;  %v1028_v3 = vmul.f32 %v1837_v22, %v1021_v54  ;;  %v1062_v40 = vadd.f32 %v1041_v37, %v1894_v24 }
 0x128   : > { %v704_v13 = vpop.f32.mrf.mxu1  ;;  %v1381_v17 = vpop.f32.mrf.mxu0  ;;  %v969_v62 = vadd.f32 %v953_v6, %v930_v43  ;;  %v954_v43 = vmul.f32 %v1837_v22, %v946_v26 }
 0x129   : > { %v1022_v48 = vrot.slane %v704_v13, 7  ;;  %v1075_v23 = vrot.slane %v1381_v17, 1  ;;  %v1042_v30 = vadd.f32 %v1028_v3, %v1005_v5  ;;  %v1008_v13 = vadd.f32 %v992_v21, %v968_v46 }
 0x12a   : > { %v706_v7 = vpop.f32.mrf.mxu1  ;;  %v793_v9 = vpop.f32.mrf.mxu0 }
 0x12b   : > { %v1082_v34 = vmul.f32 %v1841_v28, %v1075_v23  ;;  %v1029_v31 = vmul.f32 %v1837_v22, %v1022_v48  ;;  %v1063_v50 = vadd.f32 %v1042_v30, %v700_v20  ;;  %v993_v20 = vmul.f32 %v1841_v28, %v985_v59 }
 0x12c   : > { %v710_v36 = vpop.f32.mrf.mxu1  ;;  %v1384_v4 = vpop.f32.mrf.mxu0  ;;  %v986_v59 = vrot.slane %v1905_v60, 1 }
 0x12d   : > { %v1023_v38 = vrot.slane %v710_v36, 7  ;;  %v1077_v39 = vrot.slane %v1384_v4, 1  ;;  %v1933_v52 = vadd.f32 %v1082_v34, %v1061_v41  ;;  %v1043_v16 = vadd.f32 %v1029_v31, %v1006_v51 }
 0x12e   : > { %v712_v44 = vpop.f32.mrf.mxu1  ;;  %v802_v47 = vpop.f32.mrf.mxu0  ;;  %v1009_v27 = vadd.f32 %v993_v20, %v969_v62  ;;  %v931_v36 = vadd.f32 %v1914_v42, %v1911_v1  ;;  %v994_v60 = vmul.f32 %v1841_v28, %v986_v59 }
 0x12f   : > { %v1030_v45 = vmul.f32 %v1837_v22, %v1023_v38  ;;  %v1084_v15 = vmul.f32 %v1841_v28, %v1077_v39  ;;  %v1076_v25 = vrot.slane %v802_v47, 1  ;;  %v1133_v24 = vmul.f32 %v1933_v52, %v1933_v52 }
 0x130   : > { %v716_v14 = vpop.f32.mrf.mxu1  ;;  %v1387_v53 = vpop.f32.mrf.mxu0  ;;  %v1064_v23 = vadd.f32 %v1043_v16, %v706_v7 }
 0x131   : > { %v1044_v54 = vadd.f32 %v1030_v45, %v1007_v8  ;;  %v1083_v56 = vmul.f32 %v1841_v28, %v1076_v25  ;;  %v1024_v57 = vrot.slane %v716_v14, 7  ;;  %v1937_v58 = vadd.f32 %v1084_v15, %v1063_v50 }
 0x132   : > { %v1079_v55 = vrot.slane %v1387_v53, 1  ;;  %v718_v61 = vpop.f32.mrf.mxu1  ;;  %v812_v0 = vpop.f32.mrf.mxu0  ;;  %v970_v25 = vadd.f32 %v954_v43, %v931_v36 }
 0x133   : > { %v1940_v2 = vadd.f32 %v1083_v56, %v1062_v40  ;;  %v1031_v3 = vmul.f32 %v1837_v22, %v1024_v57  ;;  %v1065_v17 = vadd.f32 %v1044_v54, %v712_v44  ;;  %v1078_v33 = vrot.slane %v812_v0, 1 }
 0x134   : > { %v1086_v18 = vmul.f32 %v1841_v28, %v1079_v55  ;;  %v722_v5 = vpop.f32.mrf.mxu1  ;;  %v1390_v49 = vpop.f32.mrf.mxu0  ;;  %v1135_v9 = vmul.f32 %v1937_v58, %v1937_v58  ;;  %v1010_v14 = vadd.f32 %v994_v60, %v970_v25 }
 0x135   : > { %v1118_v19 = vadd.f32 %v1940_v2, %v1933_v52  ;;  %v1134_v6 = vmul.f32 %v1940_v2, %v1940_v2  ;;  %v1045_v63 = vadd.f32 %v1031_v3, %v1008_v13  ;;  %v1025_v48 = vrot.slane %v722_v5, 7 }
 0x136   : > { %v1085_v10 = vmul.f32 %v1841_v28, %v1078_v33  ;;  %v822_v12 = vpop.f32.mrf.mxu0  ;;  %v1081_v34 = vrot.slane %v1390_v49, 1  ;;  %v1956_v4 = vadd.f32 %v1086_v18, %v1065_v17  ;;  %v724_v42 = vpop.f32.mrf.mxu1  ;;  %v1140_v57 = vmul.f32 %v1010_v14, %v1010_v14 }
 0x137   : > { %v1141_v29 = vadd.f32 %v1134_v6, %v1133_v24  ;;  %v1032_v30 = vmul.f32 %v1837_v22, %v1025_v48  ;;  %v1080_v35 = vrot.slane %v822_v12, 1  ;;  %v1119_v7 = vadd.f32 %v1118_v19, %v1937_v58 }
 0x138   : > { %v1958_v37 = vadd.f32 %v1085_v10, %v1064_v23  ;;  %v1066_v38 = vadd.f32 %v1045_v63, %v718_v61  ;;  %v1088_v44 = vmul.f32 %v1841_v28, %v1081_v34  ;;  %v1137_v15 = vmul.f32 %v1956_v4, %v1956_v4  ;;  %v1164_v10 = vld [vmem:[%s2041_s2] sm:$0x1] }
 0x139   : > { %v1046_v39 = vadd.f32 %v1032_v30, %v1009_v27  ;;  %v1087_v8 = vmul.f32 %v1841_v28, %v1080_v35  ;;  %v1142_v41 = vadd.f32 %v1141_v29, %v1135_v9  ;;  %v1172_v27 = vsub.s32 0, %v1820_v11  ;;  %v1166_v30 = vld [vmem:[%s2042_s3] sm:$0x1] }
 0x13a   : > { %v1136_v1 = vmul.f32 %v1958_v37, %v1958_v37  ;;  %v1120_v31 = vadd.f32 %v1119_v7, %v1958_v37 }
 0x13b   : > { %v1067_v47 = vadd.f32 %v1046_v39, %v724_v42  ;;  %v1101_v45 = vadd.f32 %v1087_v8, %v1066_v38 }
 0x13c   : > { %v1121_v32 = vadd.f32 %v1120_v31, %v1956_v4  ;;  %v1143_v46 = vadd.f32 %v1142_v41, %v1136_v1 }
 0x13d   : > { %v1102_v22 = vadd.f32 %v1088_v44, %v1067_v47  ;;  %v1138_v26 = vmul.f32 %v1101_v45, %v1101_v45 }
 0x13e   : > { %v1122_v21 = vadd.f32 %v1121_v32, %v1101_v45  ;;  %v1144_v50 = vadd.f32 %v1143_v46, %v1137_v15 }
 0x13f   : > { %v1139_v51 = vmul.f32 %v1102_v22, %v1102_v22 }
 0x140   : > { %v1123_v53 = vadd.f32 %v1122_v21, %v1102_v22  ;;  %v1145_v40 = vadd.f32 %v1144_v50, %v1138_v26 }
 0x142   : > { %v1124_v54 = vadd.f32 %v1123_v53, %v1010_v14  ;;  %v1146_v56 = vadd.f32 %v1145_v40, %v1139_v51 }
 0x144   : > { %1125 = vadd.xlane.f32.xlu0 %v1124_v54  ;;  %v1147_v16 = vadd.f32 %v1146_v56, %v1140_v57 }
 0x148   : > { %1148 = vadd.xlane.f32.xlu0 %v1147_v16 }
 0x1cd   : > { %v1126_v55 = vpop.xlane.xlu0 %1125 }
 0x1ce   : > { %v1127_v61 = vrot.slane %v1126_v55, 4 }
 0x1d0   : > { %v1128_v0 = vadd.f32 %v1127_v61, %v1126_v55 }
 0x1d1   : > { %v1149_v62 = vpop.xlane.xlu0 %1148 }
 0x1d2   : > { %v1129_v20 = vrot.slane %v1128_v0, 2  ;;  %v1150_v3 = vrot.slane %v1149_v62, 4 }
 0x1d4   : > { %v1130_v13 = vadd.f32 %v1129_v20, %v1128_v0  ;;  %v1151_v28 = vadd.f32 %v1150_v3, %v1149_v62 }
 0x1d6   : > { %v1131_v24 = vrot.slane %v1130_v13, 1  ;;  %v1152_v17 = vrot.slane %v1151_v28, 2 }
 0x1d8   : > { %v1132_v18 = vadd.f32 %v1131_v24, %v1130_v13  ;;  %v1153_v33 = vadd.f32 %v1152_v17, %v1151_v28 }
 0x1da   : > { %v1157_v5 = vmul.f32 0.00048828125, %v1132_v18  ;;  %v1154_v49 = vrot.slane %v1153_v33, 1 }
 0x1dc   : > { %v1155_v19 = vadd.f32 %v1154_v49, %v1153_v33  ;;  %v1159_v6 = vmul.f32 %v1157_v5, %v1157_v5 }
 0x1de   : > { %v1158_v63 = vmul.f32 0.00048828125, %v1155_v19 }
 0x1e0   : > { %v1160_v48 = vsub.f32 %v1158_v63, %v1159_v6 }
 0x1e2   : > { %v1161_v23 = vmax.f32 %v1160_v48, 0.0 }
 0x1e4   : > { %v1162_v9 = vadd.f32 1e-05, %v1161_v23 }
 0x1e6   : > { %1454 = vrsqrt.f32 %v1162_v9 }
 0x1f3   : > { %v1455_v12 = vpop.eup %1454 }
 0x1f4   : > { %v1165_v29 = vmul.f32 %v1455_v12, %v1164_v10 }
 0x1f6   : > { %v1167_v34 = vmul.f32 %v1165_v29, %v1157_v5  ;;  %v1173_v35 = vrot.slane %v1165_v29, %v1172_v27 }
 0x1f8   : > { %v1168_v36 = vsub.f32 %v1166_v30, %v1167_v34  ;;  %v1175_v7 = vmul.f32 %v1173_v35, %v1933_v52  ;;  %v1176_v39 = vmul.f32 %v1173_v35, %v1940_v2  ;;  %v1177_v11 = vmul.f32 %v1173_v35, %v1937_v58 }
 0x1f9   : > { %v1178_v8 = vmul.f32 %v1173_v35, %v1958_v37  ;;  %v1179_v41 = vmul.f32 %v1173_v35, %v1956_v4  ;;  %v1180_v43 = vmul.f32 %v1173_v35, %v1101_v45  ;;  %v1181_v59 = vmul.f32 %v1173_v35, %v1102_v22 }
 0x1fa   : > { %v1187_v38 = vrot.slane %v1168_v36, %v1172_v27  ;;  %v1182_v1 = vmul.f32 %v1173_v35, %v1010_v14 }
 0x1fc   : > { %v1189_v42 = vadd.f32 %v1187_v38, %v1175_v7  ;;  %v1190_v31 = vadd.f32 %v1187_v38, %v1176_v39  ;;  %v1191_v44 = vadd.f32 %v1187_v38, %v1177_v11  ;;  %v1192_v47 = vadd.f32 %v1187_v38, %v1178_v8 }
 0x1fd   : > { %v1193_v52 = vadd.f32 %v1187_v38, %v1179_v41  ;;  %v1194_v15 = vadd.f32 %v1187_v38, %v1180_v43  ;;  %v1195_v25 = vadd.f32 %v1187_v38, %v1181_v59  ;;  %v1196_v2 = vadd.f32 %v1187_v38, %v1182_v1 }
 0x1fe   : > { %v1197_v32 = vmax.f32 %v1189_v42, 0.0  ;;  %v1198_v58 = vmax.f32 %v1190_v31, 0.0  ;;  %v1199_v46 = vmax.f32 %v1191_v44, 0.0  ;;  %v1200_v37 = vmax.f32 %v1192_v47, 0.0 }
 0x1ff   : > { %v1201_v4 = vmax.f32 %v1193_v52, 0.0  ;;  %v1202_v45 = vmax.f32 %v1194_v15, 0.0  ;;  %v1203_v22 = vmax.f32 %v1195_v25, 0.0  ;;  %v1204_v26 = vmax.f32 %v1196_v2, 0.0 }
 0x200   : > { %1205 = vst [vmem:[%s205_s30] sm:$0xff] %v1197_v32  ;;  %1206 = vst [vmem:[%s205_s30 + $0x8] sm:$0xff] %v1198_v58 }
 0x201   : > { %1207 = vst [vmem:[%s205_s30 + $0x10] sm:$0xff] %v1199_v46  ;;  %1208 = vst [vmem:[%s205_s30 + $0x18] sm:$0xff] %v1200_v37 }
 0x202   : > { %1209 = vst [vmem:[%s205_s30 + $0x20] sm:$0xff] %v1201_v4  ;;  %1210 = vst [vmem:[%s205_s30 + $0x28] sm:$0xff] %v1202_v45 }
 0x203   : > { %1211 = vst [vmem:[%s205_s30 + $0x30] sm:$0xff] %v1203_v22  ;;  %1212 = vst [vmem:[%s205_s30 + $0x38] sm:$0xff] %v1204_v26 }
 0x204   : > { %1495 = shalt.err (!%p1492_p0)
}
 0x205   : > { %s1496_s13 = scalar_lea.hbm %s1993_s8, 1024  ;;  %s1500_s22 = scalar_lea.hbm %s2043_s4, 2048 }
 0x206   : > { %p1497_p1 = scmp.ne.s32.totalorder %s1993_s8, %s1496_s13  ;;  %p1501_p4 = scmp.lt.s32.totalorder %s1993_s8, %s2043_s4 }
 0x207   : > { %p1502_p7 = scmp.lt.s32.totalorder %s1500_s22, %s1496_s13 }
 0x208   : > { %p1498_p2 = pnand %p1497_p1, %p1618_p5 }
 0x209   : > { %p1503_p8 = por %p1502_p7, %p1501_p4 }
 0x20a   : > { %p1499_p3 = pneg %p1498_p2 }
 0x20c   : > { %p1504_p6 = pnand %p1503_p8, %p1499_p3 }
 0x20e   : > { %1507 = shalt.err (!%p1504_p6)
}
 0x20f   : > { %s1553_s28 = smov 128   ;;  %s1554_s29 = smov 8  }
 0x210   : > { %1403 = dma.vmem_to_hbm [thread:$0]  (%p1618_p5), %s1995_s5, 1024, %s1993_s8, %s1999_s19, %s1553_s28, %s1553_s28, %s1554_s29  }
 0x211 PF: > { %p1415_p9 = scmp.ge.s32.totalorder %s1546_s18, 2  ;;  %s1242_s30 = sand.u32 1, %s1534_s15  }
 0x212   : > { %p2047_p10 = scmp.ne.s32.totalorder %s2045_s26, 0  ;;  %s1243_s6 = scalar_lea.sflag [#allocation5], %s1242_s30 }
 0x214   : > { %p1410_p11 = pnand %p1415_p9, %p2047_p10 }
 0x216   : > { %p1411_p12 = pneg %p1410_p11 }
 0x218   : > { %1529 = dma.done.wait (%p1411_p12), %s1243_s6, 1024  }
 0x219   : > { %1531 = vsyncadd (%p1411_p12), %s1243_s6, 4294966272  ;;  %p15_p13 = scmp.ge.s32.totalorder %s1605_s21, 4   ;;  %s2048_s15 = smov %s1538_s16 }
 0x21a   : > { %s2049_s16 = smov %s1542_s17  ;;  %s2050_s17 = smov %s1616_s24 }
 0x21b   : > { %s2051_s18 = smov %s1605_s21  ;;  %17 = sbr.rel (!%p15_p13) target bundleno = 4 (0x4), region = 77 }
 0x220   :  { %1248 = vsyncpa [#allocation4], 1 }
 0x221   :  { %1250 = vsyncpa [#allocation4 + $0x1], 1 }
 0x222   :  { %1251 = vsyncpa [#allocation5], 1 }
 0x223   :  { %1253 = vsyncpa [#allocation5 + $0x1], 1 }

</bundles_post_ra>
